<compile_context>
chip_gen: v6e
topology: v6e:2x2x1
jax: 0.10.0
libtpu: 0.0.40
codegen_flags: <defaults>
</compile_context>

<pallas_src>
import functools
import math

import numpy as np
import jax
import jax.numpy as jnp
from jax.experimental import pallas as pl
from jax.experimental.pallas import tpu as pltpu


COMPUTE_DTYPE = jnp.bfloat16        # MXU input dtype (f32 accumulate).
LN_EPS = 1e-5
VMEM_LIMIT = 32 * 1024 * 1024       # explicit scoped-VMEM budget (fits v7x 64 MiB)


def _choose_batch_block(n_batch, seq_len, target_rows=256):
    """Batch elements per grid step.  Prefer >=2 grid steps when the batch
    allows (keeps both v7x TensorCores busy), then maximize rows per step
    (up to ~target_rows) to fill the MXU / amortize per-step overhead."""
    best = 1
    for bn in range(1, n_batch + 1):
        if n_batch % bn:
            continue
        if n_batch >= 2 and (n_batch // bn) < 2:
            continue
        if bn * seq_len <= target_rows:
            best = bn
    return best


def _layer_norm(y, g, b):
    mean = jnp.mean(y, axis=-1, keepdims=True)
    var = jnp.mean((y - mean) ** 2, axis=-1, keepdims=True)
    return (y - mean) * jax.lax.rsqrt(var + LN_EPS) * g + b


# ----------------------------- fused kernel -----------------------------

def _fused_encoder_kernel(src_ref, pe_ref, emb_w_ref, emb_b_ref,
                          wq_ref, bq_ref, wk_ref, bk_ref, wv_ref, bv_ref,
                          wo_ref, bo_ref, ln1g_ref, ln1b_ref,
                          ff1w_ref, ff1b_ref, ff2w_ref, ff2b_ref,
                          ln2g_ref, ln2b_ref, dec_w_ref, dec_b_ref,
                          o_ref, *, num_layers, nhead):
    Bn, S, F = src_ref.shape
    D = emb_w_ref.shape[1]
    Dh = D // nhead
    scale = 1.0 / math.sqrt(Dh)
    M = Bn * S

    # ---- embedding linear + positional encoding (PE broadcast over batch) ----
    x = src_ref[...].astype(COMPUTE_DTYPE).reshape(M, F)
    h = jnp.dot(x, emb_w_ref[...], preferred_element_type=jnp.float32)
    h = h + emb_b_ref[...].astype(jnp.float32)
    pe = pe_ref[...].astype(jnp.float32)
    h = (h.reshape(Bn, S, D) + pe[None, :, :]).reshape(M, D)   # f32

    # ---- encoder layers (post-norm, as in PyTorch default) ----
    for l in range(num_layers):
        xin = h                                   # (M, D) f32
        xc = xin.astype(COMPUTE_DTYPE)
        q = jnp.dot(xc, wq_ref[l], preferred_element_type=jnp.float32) + bq_ref[l]
        k = jnp.dot(xc, wk_ref[l], preferred_element_type=jnp.float32) + bk_ref[l]
        v = jnp.dot(xc, wv_ref[l], preferred_element_type=jnp.float32) + bv_ref[l]
        q = q * scale                             # fold 1/sqrt(Dh) into q once

        q3 = q.reshape(Bn, S, D).astype(COMPUTE_DTYPE)
        k3 = k.reshape(Bn, S, D).astype(COMPUTE_DTYPE)
        v3 = v.reshape(Bn, S, D).astype(COMPUTE_DTYPE)
        wo_l = wo_ref[l]                          # (D, D) bf16, loaded once/layer

        # Accumulate the output projection head-by-head:
        #   concat_h(o_h) @ W_out == sum_h o_h @ W_out[h*Dh:(h+1)*Dh, :]
        proj = jnp.zeros((M, D), jnp.float32)
        # TODO(synk): batch the head loop with a head-batched contraction once
        # multi-batch-dim dot_general lowering is verified; with nhead=4 and
        # Dh=8 the unrolled loop is latency-negligible.
        for hh in range(nhead):
            sl = slice(hh * Dh, (hh + 1) * Dh)
            s = jnp.einsum('bqd,bkd->bqk', q3[:, :, sl], k3[:, :, sl],
                           preferred_element_type=jnp.float32)      # (Bn,S,S)
            mmax = jnp.max(s, axis=-1, keepdims=True)
            p = jnp.exp(s - mmax)
            p = p * pl.reciprocal(jnp.sum(p, axis=-1, keepdims=True), approx=True)
            oh = jnp.einsum('bqk,bkd->bqd', p.astype(COMPUTE_DTYPE), v3[:, :, sl],
                            preferred_element_type=jnp.float32)     # (Bn,S,Dh)
            proj = proj + jnp.dot(oh.reshape(M, Dh).astype(COMPUTE_DTYPE),
                                  wo_l[sl, :], preferred_element_type=jnp.float32)

        y = xin + proj + bo_ref[l].astype(jnp.float32)       # residual
        y = _layer_norm(y, ln1g_ref[l].astype(jnp.float32),
                        ln1b_ref[l].astype(jnp.float32))

        # feed-forward: relu(y @ W1 + b1) @ W2 + b2, residual, LN2
        f = jnp.dot(y.astype(COMPUTE_DTYPE), ff1w_ref[l],
                    preferred_element_type=jnp.float32)
        f = jnp.maximum(f + ff1b_ref[l].astype(jnp.float32), 0.0)
        f2 = jnp.dot(f.astype(COMPUTE_DTYPE), ff2w_ref[l],
                     preferred_element_type=jnp.float32)
        f2 = f2 + ff2b_ref[l].astype(jnp.float32)
        h = _layer_norm(y + f2, ln2g_ref[l].astype(jnp.float32),
                        ln2b_ref[l].astype(jnp.float32))

    # ---- decoder head (out_features = 1): VPU multiply + lane reduction ----
    out = jnp.sum(h * dec_w_ref[...].astype(jnp.float32), axis=-1, keepdims=True)
    out = out + dec_b_ref[...].astype(jnp.float32)
    o_ref[...] = out.reshape(Bn, S, 1).astype(o_ref.dtype)


def fused_transformer_pallas(x, pe, emb_w, emb_b, stacked, dec_w, dec_b,
                             num_layers, nhead, batch_block):
    """x: (N, S, F) batch-major input.  Returns (N, S, 1)."""
    N, S, F = x.shape
    D = emb_w.shape[1]
    Bn = batch_block

    def _const_spec(a):
        if a.ndim == 2:
            return pl.BlockSpec(a.shape, lambda n: (0, 0))
        return pl.BlockSpec(a.shape, lambda n: (0, 0, 0))

    in_arrays = [x, pe, emb_w, emb_b,
                 stacked["wq"], stacked["bq"], stacked["wk"], stacked["bk"],
                 stacked["wv"], stacked["bv"], stacked["wo"], stacked["bo"],
                 stacked["ln1_g"], stacked["ln1_b"],
                 stacked["ff1_w"], stacked["ff1_b"],
                 stacked["ff2_w"], stacked["ff2_b"],
                 stacked["ln2_g"], stacked["ln2_b"],
                 dec_w, dec_b]
    in_specs = [pl.BlockSpec((Bn, S, F), lambda n: (n, 0, 0))]
    in_specs += [_const_spec(a) for a in in_arrays[1:]]

    kernel = functools.partial(_fused_encoder_kernel,
                               num_layers=num_layers, nhead=nhead)
    return pl.pallas_call(
        kernel,
        out_shape=jax.ShapeDtypeStruct((N, S, 1), jnp.float32),
        grid=(N // Bn,),
        in_specs=in_specs,
        out_specs=pl.BlockSpec((Bn, S, 1), lambda n: (n, 0, 0)),
        compiler_params=pltpu.CompilerParams(
            dimension_semantics=("parallel",),
            vmem_limit_bytes=VMEM_LIMIT),
    )(*in_arrays)


# ----------------------------- model glue -----------------------------

def make_positional_encoding(d_model, max_len=5000):
    position = np.arange(max_len, dtype=np.float32)[:, None]
    div_term = np.exp(np.arange(0, d_model, 2, dtype=np.float32)
                      * (-np.log(10000.0) / d_model))
    pe = np.zeros((max_len, d_model), dtype=np.float32)
    pe[:, 0::2] = np.sin(position * div_term)
    pe[:, 1::2] = np.cos(position * div_term)
    return jnp.asarray(pe)                      # (max_len, d_model)


def init_params(key, feature_size, d_model, nhead, num_layers, dim_feedforward):
    # NOTE: weights are stored (in, out) and applied as x @ W (PyTorch stores
    # (out, in) and computes x @ W.T) — transpose when importing torch weights.
    initrange = 0.1
    keys = jax.random.split(key, 2 + 8 * num_layers)
    ki = iter(keys)
    params = {
        "emb_w": jax.random.uniform(next(ki), (feature_size, d_model),
                                    minval=-initrange, maxval=initrange,
                                    dtype=jnp.float32),
        "emb_b": jnp.zeros((d_model,), jnp.float32),
        "dec_w": jax.random.uniform(next(ki), (d_model, 1),
                                    minval=-initrange, maxval=initrange,
                                    dtype=jnp.float32),
        "dec_b": jnp.zeros((1,), jnp.float32),
        "pe": make_positional_encoding(d_model),
        "layers": [],
    }
    for _ in range(num_layers):
        layer = {
            "wq": jax.random.normal(next(ki), (d_model, d_model), jnp.float32) * 0.05,
            "wk": jax.random.normal(next(ki), (d_model, d_model), jnp.float32) * 0.05,
            "wv": jax.random.normal(next(ki), (d_model, d_model), jnp.float32) * 0.05,
            "bq": jnp.zeros((d_model,), jnp.float32),
            "bk": jnp.zeros((d_model,), jnp.float32),
            "bv": jnp.zeros((d_model,), jnp.float32),
            "wo": jax.random.normal(next(ki), (d_model, d_model), jnp.float32) * 0.05,
            "bo": jnp.zeros((d_model,), jnp.float32),
            "ff1_w": jax.random.normal(next(ki), (d_model, dim_feedforward),
                                       jnp.float32) * 0.05,
            "ff1_b": jnp.zeros((dim_feedforward,), jnp.float32),
            "ff2_w": jax.random.normal(next(ki), (dim_feedforward, d_model),
                                       jnp.float32) * 0.05,
            "ff2_b": jnp.zeros((d_model,), jnp.float32),
            "ln1_g": jnp.ones((d_model,), jnp.float32),
            "ln1_b": jnp.zeros((d_model,), jnp.float32),
            "ln2_g": jnp.ones((d_model,), jnp.float32),
            "ln2_b": jnp.zeros((d_model,), jnp.float32),
        }
        params["layers"].append(layer)
    return params


def stock_transformer_forward(params, src, nhead):
    # src: (S, N, feature_size) — PyTorch layout.  The tiny raw input is
    # transposed once to batch-major; everything else happens in one kernel.
    S, N, F = src.shape
    layers = params["layers"]
    L = len(layers)

    def stack_w(name):   # matmul weights -> bf16 once (halves DMA / VMEM)
        return jnp.stack([ly[name] for ly in layers]).astype(COMPUTE_DTYPE)

    def stack_v(name):   # bias / LN vectors -> (L, 1, dim) f32
        return jnp.stack([ly[name] for ly in layers])[:, None, :].astype(jnp.float32)

    stacked = {
        "wq": stack_w("wq"), "wk": stack_w("wk"), "wv": stack_w("wv"),
        "wo": stack_w("wo"), "ff1_w": stack_w("ff1_w"), "ff2_w": stack_w("ff2_w"),
        "bq": stack_v("bq"), "bk": stack_v("bk"), "bv": stack_v("bv"),
        "bo": stack_v("bo"), "ff1_b": stack_v("ff1_b"), "ff2_b": stack_v("ff2_b"),
        "ln1_g": stack_v("ln1_g"), "ln1_b": stack_v("ln1_b"),
        "ln2_g": stack_v("ln2_g"), "ln2_b": stack_v("ln2_b"),
    }

    x = jnp.transpose(src, (1, 0, 2))                     # (N, S, F)
    pe = params["pe"][:S]                                 # (S, D)
    Bn = _choose_batch_block(N, S)

    out = fused_transformer_pallas(
        x, pe,
        params["emb_w"].astype(COMPUTE_DTYPE),
        params["emb_b"].reshape(1, -1).astype(jnp.float32),
        stacked,
        params["dec_w"].reshape(1, -1).astype(jnp.float32),
        params["dec_b"].reshape(1, 1).astype(jnp.float32),
        L, nhead, Bn)                                     # (N, S, 1)

    return jnp.transpose(out, (1, 0, 2))                  # (S, N, 1)


if __name__ == "__main__":
    # Small, forward-consistent shapes.
    feature_size = 4
    d_model = 32
    nhead = 4
    num_layers = 2
    dim_feedforward = 64
    seq_len = 8
    batch = 2

    key = jax.random.PRNGKey(0)
    k_param, k_src = jax.random.split(key)

    params = init_params(k_param, feature_size, d_model, nhead,
                         num_layers, dim_feedforward)
    src = jax.random.normal(k_src, (seq_len, batch, feature_size),
                            dtype=jnp.float32)

    fwd = jax.jit(functools.partial(stock_transformer_forward, nhead=nhead))
    out = fwd(params, src)
    out = jax.block_until_ready(out)

    assert out.shape == (seq_len, batch, 1), out.shape
    assert jnp.all(jnp.isfinite(out))
    print("KERNEL_OK")
</pallas_src>

<mosaic_0001>
module attributes {stable_mosaic.version = 11 : i64} {
  func.func @_fused_encoder_kernel(%arg0: i32, %arg1: memref<1x8x4xf32, #tpu.memory_space<vmem>>, %arg2: memref<8x32xf32, #tpu.memory_space<vmem>>, %arg3: memref<4x32xbf16, #tpu.memory_space<vmem>>, %arg4: memref<1x32xf32, #tpu.memory_space<vmem>>, %arg5: memref<2x32x32xbf16, #tpu.memory_space<vmem>>, %arg6: memref<2x1x32xf32, #tpu.memory_space<vmem>>, %arg7: memref<2x32x32xbf16, #tpu.memory_space<vmem>>, %arg8: memref<2x1x32xf32, #tpu.memory_space<vmem>>, %arg9: memref<2x32x32xbf16, #tpu.memory_space<vmem>>, %arg10: memref<2x1x32xf32, #tpu.memory_space<vmem>>, %arg11: memref<2x32x32xbf16, #tpu.memory_space<vmem>>, %arg12: memref<2x1x32xf32, #tpu.memory_space<vmem>>, %arg13: memref<2x1x32xf32, #tpu.memory_space<vmem>>, %arg14: memref<2x1x32xf32, #tpu.memory_space<vmem>>, %arg15: memref<2x32x64xbf16, #tpu.memory_space<vmem>>, %arg16: memref<2x1x64xf32, #tpu.memory_space<vmem>>, %arg17: memref<2x64x32xbf16, #tpu.memory_space<vmem>>, %arg18: memref<2x1x32xf32, #tpu.memory_space<vmem>>, %arg19: memref<2x1x32xf32, #tpu.memory_space<vmem>>, %arg20: memref<2x1x32xf32, #tpu.memory_space<vmem>>, %arg21: memref<1x32xf32, #tpu.memory_space<vmem>>, %arg22: memref<1x1xf32, #tpu.memory_space<vmem>>, %arg23: memref<1x8x1xf32, #tpu.memory_space<vmem>>) attributes {dimension_semantics = [#tpu.dimension_semantics<parallel>], iteration_bounds = array<i64: 2>, scalar_prefetch = 0 : i64, scratch_operands = 0 : i64, tpu.core_type = #tpu.core_type<tc>, window_params = [{transform_indices = @transform_0, window_bounds = array<i64: 1, 8, 4>}, {pipeline_mode = #tpu.pipeline_mode<synchronous>, transform_indices = @transform_1, window_bounds = array<i64: 8, 32>}, {pipeline_mode = #tpu.pipeline_mode<synchronous>, transform_indices = @transform_2, window_bounds = array<i64: 4, 32>}, {pipeline_mode = #tpu.pipeline_mode<synchronous>, transform_indices = @transform_3, window_bounds = array<i64: 1, 32>}, {pipeline_mode = #tpu.pipeline_mode<synchronous>, transform_indices = @transform_4, window_bounds = array<i64: 2, 32, 32>}, {pipeline_mode = #tpu.pipeline_mode<synchronous>, transform_indices = @transform_5, window_bounds = array<i64: 2, 1, 32>}, {pipeline_mode = #tpu.pipeline_mode<synchronous>, transform_indices = @transform_6, window_bounds = array<i64: 2, 32, 32>}, {pipeline_mode = #tpu.pipeline_mode<synchronous>, transform_indices = @transform_7, window_bounds = array<i64: 2, 1, 32>}, {pipeline_mode = #tpu.pipeline_mode<synchronous>, transform_indices = @transform_8, window_bounds = array<i64: 2, 32, 32>}, {pipeline_mode = #tpu.pipeline_mode<synchronous>, transform_indices = @transform_9, window_bounds = array<i64: 2, 1, 32>}, {pipeline_mode = #tpu.pipeline_mode<synchronous>, transform_indices = @transform_10, window_bounds = array<i64: 2, 32, 32>}, {pipeline_mode = #tpu.pipeline_mode<synchronous>, transform_indices = @transform_11, window_bounds = array<i64: 2, 1, 32>}, {pipeline_mode = #tpu.pipeline_mode<synchronous>, transform_indices = @transform_12, window_bounds = array<i64: 2, 1, 32>}, {pipeline_mode = #tpu.pipeline_mode<synchronous>, transform_indices = @transform_13, window_bounds = array<i64: 2, 1, 32>}, {pipeline_mode = #tpu.pipeline_mode<synchronous>, transform_indices = @transform_14, window_bounds = array<i64: 2, 32, 64>}, {pipeline_mode = #tpu.pipeline_mode<synchronous>, transform_indices = @transform_15, window_bounds = array<i64: 2, 1, 64>}, {pipeline_mode = #tpu.pipeline_mode<synchronous>, transform_indices = @transform_16, window_bounds = array<i64: 2, 64, 32>}, {pipeline_mode = #tpu.pipeline_mode<synchronous>, transform_indices = @transform_17, window_bounds = array<i64: 2, 1, 32>}, {pipeline_mode = #tpu.pipeline_mode<synchronous>, transform_indices = @transform_18, window_bounds = array<i64: 2, 1, 32>}, {pipeline_mode = #tpu.pipeline_mode<synchronous>, transform_indices = @transform_19, window_bounds = array<i64: 2, 1, 32>}, {pipeline_mode = #tpu.pipeline_mode<synchronous>, transform_indices = @transform_20, window_bounds = array<i64: 1, 32>}, {pipeline_mode = #tpu.pipeline_mode<synchronous>, transform_indices = @transform_21, window_bounds = array<i64: 1, 1>}, {transform_indices = @transform_22, window_bounds = array<i64: 1, 8, 1>}]} {
    %c0 = arith.constant 0 : index
    %c0_0 = arith.constant 0 : index
    %c0_1 = arith.constant 0 : index
    %0 = vector.load %arg1[%c0, %c0_0, %c0_1] : memref<1x8x4xf32, #tpu.memory_space<vmem>>, vector<1x8x4xf32>
    %1 = arith.truncf %0 : vector<1x8x4xf32> to vector<1x8x4xbf16>
    %2 = vector.shape_cast %1 : vector<1x8x4xbf16> to vector<8x4xbf16>
    %c0_2 = arith.constant 0 : index
    %c0_3 = arith.constant 0 : index
    %3 = vector.load %arg3[%c0_2, %c0_3] : memref<4x32xbf16, #tpu.memory_space<vmem>>, vector<4x32xbf16>
    %cst = arith.constant dense<0.000000e+00> : vector<8x32xf32>
    %4 = tpu.matmul %2, %3, %cst {dimension_numbers = #tpu.dot_dimension_numbers<[1], [0], [0], [1], [0, 0, 1, 1], [], []>} : vector<8x4xbf16>, vector<4x32xbf16>, vector<8x32xf32> -> vector<8x32xf32>
    %c0_4 = arith.constant 0 : index
    %c0_5 = arith.constant 0 : index
    %5 = vector.load %arg4[%c0_4, %c0_5] : memref<1x32xf32, #tpu.memory_space<vmem>>, vector<1x32xf32>
    %6 = vector.broadcast %5 : vector<1x32xf32> to vector<8x32xf32>
    %7 = arith.addf %4, %6 : vector<8x32xf32>
    %c0_6 = arith.constant 0 : index
    %c0_7 = arith.constant 0 : index
    %8 = vector.load %arg2[%c0_6, %c0_7] : memref<8x32xf32, #tpu.memory_space<vmem>>, vector<8x32xf32>
    %9 = vector.shape_cast %7 : vector<8x32xf32> to vector<1x8x32xf32>
    %10 = vector.shape_cast %8 : vector<8x32xf32> to vector<1x8x32xf32>
    %11 = arith.addf %9, %10 : vector<1x8x32xf32>
    %12 = vector.shape_cast %11 : vector<1x8x32xf32> to vector<8x32xf32>
    %13 = arith.truncf %12 : vector<8x32xf32> to vector<8x32xbf16>
    %c0_8 = arith.constant 0 : index
    %c0_9 = arith.constant 0 : index
    %c0_10 = arith.constant 0 : index
    %14 = vector.load %arg5[%c0_8, %c0_9, %c0_10] : memref<2x32x32xbf16, #tpu.memory_space<vmem>>, vector<1x32x32xbf16>
    %15 = vector.shape_cast %14 : vector<1x32x32xbf16> to vector<32x32xbf16>
    %cst_11 = arith.constant dense<0.000000e+00> : vector<8x32xf32>
    %16 = tpu.matmul %13, %15, %cst_11 {dimension_numbers = #tpu.dot_dimension_numbers<[1], [0], [0], [1], [0, 0, 1, 1], [], []>} : vector<8x32xbf16>, vector<32x32xbf16>, vector<8x32xf32> -> vector<8x32xf32>
    %c0_12 = arith.constant 0 : index
    %c0_13 = arith.constant 0 : index
    %c0_14 = arith.constant 0 : index
    %17 = vector.load %arg6[%c0_12, %c0_13, %c0_14] : memref<2x1x32xf32, #tpu.memory_space<vmem>>, vector<1x1x32xf32>
    %18 = vector.shape_cast %17 : vector<1x1x32xf32> to vector<1x32xf32>
    %19 = vector.broadcast %18 : vector<1x32xf32> to vector<8x32xf32>
    %20 = arith.addf %16, %19 : vector<8x32xf32>
    %c0_15 = arith.constant 0 : index
    %c0_16 = arith.constant 0 : index
    %c0_17 = arith.constant 0 : index
    %21 = vector.load %arg7[%c0_15, %c0_16, %c0_17] : memref<2x32x32xbf16, #tpu.memory_space<vmem>>, vector<1x32x32xbf16>
    %22 = vector.shape_cast %21 : vector<1x32x32xbf16> to vector<32x32xbf16>
    %cst_18 = arith.constant dense<0.000000e+00> : vector<8x32xf32>
    %23 = tpu.matmul %13, %22, %cst_18 {dimension_numbers = #tpu.dot_dimension_numbers<[1], [0], [0], [1], [0, 0, 1, 1], [], []>} : vector<8x32xbf16>, vector<32x32xbf16>, vector<8x32xf32> -> vector<8x32xf32>
    %c0_19 = arith.constant 0 : index
    %c0_20 = arith.constant 0 : index
    %c0_21 = arith.constant 0 : index
    %24 = vector.load %arg8[%c0_19, %c0_20, %c0_21] : memref<2x1x32xf32, #tpu.memory_space<vmem>>, vector<1x1x32xf32>
    %25 = vector.shape_cast %24 : vector<1x1x32xf32> to vector<1x32xf32>
    %26 = vector.broadcast %25 : vector<1x32xf32> to vector<8x32xf32>
    %27 = arith.addf %23, %26 : vector<8x32xf32>
    %c0_22 = arith.constant 0 : index
    %c0_23 = arith.constant 0 : index
    %c0_24 = arith.constant 0 : index
    %28 = vector.load %arg9[%c0_22, %c0_23, %c0_24] : memref<2x32x32xbf16, #tpu.memory_space<vmem>>, vector<1x32x32xbf16>
    %29 = vector.shape_cast %28 : vector<1x32x32xbf16> to vector<32x32xbf16>
    %cst_25 = arith.constant dense<0.000000e+00> : vector<8x32xf32>
    %30 = tpu.matmul %13, %29, %cst_25 {dimension_numbers = #tpu.dot_dimension_numbers<[1], [0], [0], [1], [0, 0, 1, 1], [], []>} : vector<8x32xbf16>, vector<32x32xbf16>, vector<8x32xf32> -> vector<8x32xf32>
    %c0_26 = arith.constant 0 : index
    %c0_27 = arith.constant 0 : index
    %c0_28 = arith.constant 0 : index
    %31 = vector.load %arg10[%c0_26, %c0_27, %c0_28] : memref<2x1x32xf32, #tpu.memory_space<vmem>>, vector<1x1x32xf32>
    %32 = vector.shape_cast %31 : vector<1x1x32xf32> to vector<1x32xf32>
    %33 = vector.broadcast %32 : vector<1x32xf32> to vector<8x32xf32>
    %34 = arith.addf %30, %33 : vector<8x32xf32>
    %cst_29 = arith.constant 0.353553385 : f32
    %35 = vector.broadcast %cst_29 : f32 to vector<8x32xf32>
    %36 = arith.mulf %20, %35 : vector<8x32xf32>
    %37 = vector.shape_cast %36 : vector<8x32xf32> to vector<1x8x32xf32>
    %38 = arith.truncf %37 : vector<1x8x32xf32> to vector<1x8x32xbf16>
    %39 = vector.shape_cast %27 : vector<8x32xf32> to vector<1x8x32xf32>
    %40 = arith.truncf %39 : vector<1x8x32xf32> to vector<1x8x32xbf16>
    %41 = vector.shape_cast %34 : vector<8x32xf32> to vector<1x8x32xf32>
    %42 = arith.truncf %41 : vector<1x8x32xf32> to vector<1x8x32xbf16>
    %c0_30 = arith.constant 0 : index
    %c0_31 = arith.constant 0 : index
    %c0_32 = arith.constant 0 : index
    %43 = vector.load %arg11[%c0_30, %c0_31, %c0_32] : memref<2x32x32xbf16, #tpu.memory_space<vmem>>, vector<1x32x32xbf16>
    %44 = vector.shape_cast %43 : vector<1x32x32xbf16> to vector<32x32xbf16>
    %cst_33 = arith.constant 0.000000e+00 : f32
    %45 = vector.broadcast %cst_33 : f32 to vector<8x32xf32>
    %46 = vector.extract_strided_slice %38 {offsets = [0, 0, 0], sizes = [1, 8, 8], strides = [1, 1, 1]} : vector<1x8x32xbf16> to vector<1x8x8xbf16>
    %47 = vector.extract_strided_slice %40 {offsets = [0, 0, 0], sizes = [1, 8, 8], strides = [1, 1, 1]} : vector<1x8x32xbf16> to vector<1x8x8xbf16>
    "tpu.trace_start"() <{level = 10 : i32, message = "bqd,bkd->bqk"}> : () -> ()
    %cst_34 = arith.constant dense<0.000000e+00> : vector<1x8x8xf32>
    %48 = tpu.matmul %46, %47, %cst_34 {dimension_numbers = #tpu.dot_dimension_numbers<[2], [2], [1], [1], [0, 0, 0, 1, 1, 1], [0], [0]>} : vector<1x8x8xbf16>, vector<1x8x8xbf16>, vector<1x8x8xf32> -> vector<1x8x8xf32>
    "tpu.trace_stop"() : () -> ()
    %cst_35 = arith.constant dense<0xFF800000> : vector<1x8xf32>
    %49 = vector.multi_reduction <maximumf>, %48, %cst_35 [2] : vector<1x8x8xf32> to vector<1x8xf32>
    %50 = vector.shape_cast %49 : vector<1x8xf32> to vector<1x8x1xf32>
    %51 = vector.broadcast %50 : vector<1x8x1xf32> to vector<1x8x8xf32>
    %52 = arith.subf %48, %51 : vector<1x8x8xf32>
    %53 = math.exp %52 : vector<1x8x8xf32>
    %cst_36 = arith.constant dense<0.000000e+00> : vector<1x8xf32>
    %54 = vector.multi_reduction <add>, %53, %cst_36 [2] : vector<1x8x8xf32> to vector<1x8xf32>
    %55 = vector.shape_cast %54 : vector<1x8xf32> to vector<1x8x1xf32>
    %56 = tpu.reciprocal %55 {approx = true} : vector<1x8x1xf32> -> vector<1x8x1xf32>
    %57 = vector.broadcast %56 : vector<1x8x1xf32> to vector<1x8x8xf32>
    %58 = arith.mulf %53, %57 : vector<1x8x8xf32>
    %59 = arith.truncf %58 : vector<1x8x8xf32> to vector<1x8x8xbf16>
    %60 = vector.extract_strided_slice %42 {offsets = [0, 0, 0], sizes = [1, 8, 8], strides = [1, 1, 1]} : vector<1x8x32xbf16> to vector<1x8x8xbf16>
    "tpu.trace_start"() <{level = 10 : i32, message = "bqk,bkd->bqd"}> : () -> ()
    %cst_37 = arith.constant dense<0.000000e+00> : vector<1x8x8xf32>
    %61 = tpu.matmul %59, %60, %cst_37 {dimension_numbers = #tpu.dot_dimension_numbers<[2], [1], [1], [2], [0, 0, 0, 1, 1, 2], [0], [0]>} : vector<1x8x8xbf16>, vector<1x8x8xbf16>, vector<1x8x8xf32> -> vector<1x8x8xf32>
    "tpu.trace_stop"() : () -> ()
    %62 = vector.shape_cast %61 : vector<1x8x8xf32> to vector<8x8xf32>
    %63 = arith.truncf %62 : vector<8x8xf32> to vector<8x8xbf16>
    %64 = vector.extract_strided_slice %44 {offsets = [0, 0], sizes = [8, 32], strides = [1, 1]} : vector<32x32xbf16> to vector<8x32xbf16>
    %cst_38 = arith.constant dense<0.000000e+00> : vector<8x32xf32>
    %65 = tpu.matmul %63, %64, %cst_38 {dimension_numbers = #tpu.dot_dimension_numbers<[1], [0], [0], [1], [0, 0, 1, 1], [], []>} : vector<8x8xbf16>, vector<8x32xbf16>, vector<8x32xf32> -> vector<8x32xf32>
    %66 = arith.addf %45, %65 : vector<8x32xf32>
    %67 = vector.extract_strided_slice %38 {offsets = [0, 0, 8], sizes = [1, 8, 8], strides = [1, 1, 1]} : vector<1x8x32xbf16> to vector<1x8x8xbf16>
    %68 = vector.extract_strided_slice %40 {offsets = [0, 0, 8], sizes = [1, 8, 8], strides = [1, 1, 1]} : vector<1x8x32xbf16> to vector<1x8x8xbf16>
    "tpu.trace_start"() <{level = 10 : i32, message = "bqd,bkd->bqk"}> : () -> ()
    %cst_39 = arith.constant dense<0.000000e+00> : vector<1x8x8xf32>
    %69 = tpu.matmul %67, %68, %cst_39 {dimension_numbers = #tpu.dot_dimension_numbers<[2], [2], [1], [1], [0, 0, 0, 1, 1, 1], [0], [0]>} : vector<1x8x8xbf16>, vector<1x8x8xbf16>, vector<1x8x8xf32> -> vector<1x8x8xf32>
    "tpu.trace_stop"() : () -> ()
    %cst_40 = arith.constant dense<0xFF800000> : vector<1x8xf32>
    %70 = vector.multi_reduction <maximumf>, %69, %cst_40 [2] : vector<1x8x8xf32> to vector<1x8xf32>
    %71 = vector.shape_cast %70 : vector<1x8xf32> to vector<1x8x1xf32>
    %72 = vector.broadcast %71 : vector<1x8x1xf32> to vector<1x8x8xf32>
    %73 = arith.subf %69, %72 : vector<1x8x8xf32>
    %74 = math.exp %73 : vector<1x8x8xf32>
    %cst_41 = arith.constant dense<0.000000e+00> : vector<1x8xf32>
    %75 = vector.multi_reduction <add>, %74, %cst_41 [2] : vector<1x8x8xf32> to vector<1x8xf32>
    %76 = vector.shape_cast %75 : vector<1x8xf32> to vector<1x8x1xf32>
    %77 = tpu.reciprocal %76 {approx = true} : vector<1x8x1xf32> -> vector<1x8x1xf32>
    %78 = vector.broadcast %77 : vector<1x8x1xf32> to vector<1x8x8xf32>
    %79 = arith.mulf %74, %78 : vector<1x8x8xf32>
    %80 = arith.truncf %79 : vector<1x8x8xf32> to vector<1x8x8xbf16>
    %81 = vector.extract_strided_slice %42 {offsets = [0, 0, 8], sizes = [1, 8, 8], strides = [1, 1, 1]} : vector<1x8x32xbf16> to vector<1x8x8xbf16>
    "tpu.trace_start"() <{level = 10 : i32, message = "bqk,bkd->bqd"}> : () -> ()
    %cst_42 = arith.constant dense<0.000000e+00> : vector<1x8x8xf32>
    %82 = tpu.matmul %80, %81, %cst_42 {dimension_numbers = #tpu.dot_dimension_numbers<[2], [1], [1], [2], [0, 0, 0, 1, 1, 2], [0], [0]>} : vector<1x8x8xbf16>, vector<1x8x8xbf16>, vector<1x8x8xf32> -> vector<1x8x8xf32>
    "tpu.trace_stop"() : () -> ()
    %83 = vector.shape_cast %82 : vector<1x8x8xf32> to vector<8x8xf32>
    %84 = arith.truncf %83 : vector<8x8xf32> to vector<8x8xbf16>
    %85 = vector.extract_strided_slice %44 {offsets = [8, 0], sizes = [8, 32], strides = [1, 1]} : vector<32x32xbf16> to vector<8x32xbf16>
    %cst_43 = arith.constant dense<0.000000e+00> : vector<8x32xf32>
    %86 = tpu.matmul %84, %85, %cst_43 {dimension_numbers = #tpu.dot_dimension_numbers<[1], [0], [0], [1], [0, 0, 1, 1], [], []>} : vector<8x8xbf16>, vector<8x32xbf16>, vector<8x32xf32> -> vector<8x32xf32>
    %87 = arith.addf %66, %86 : vector<8x32xf32>
    %88 = vector.extract_strided_slice %38 {offsets = [0, 0, 16], sizes = [1, 8, 8], strides = [1, 1, 1]} : vector<1x8x32xbf16> to vector<1x8x8xbf16>
    %89 = vector.extract_strided_slice %40 {offsets = [0, 0, 16], sizes = [1, 8, 8], strides = [1, 1, 1]} : vector<1x8x32xbf16> to vector<1x8x8xbf16>
    "tpu.trace_start"() <{level = 10 : i32, message = "bqd,bkd->bqk"}> : () -> ()
    %cst_44 = arith.constant dense<0.000000e+00> : vector<1x8x8xf32>
    %90 = tpu.matmul %88, %89, %cst_44 {dimension_numbers = #tpu.dot_dimension_numbers<[2], [2], [1], [1], [0, 0, 0, 1, 1, 1], [0], [0]>} : vector<1x8x8xbf16>, vector<1x8x8xbf16>, vector<1x8x8xf32> -> vector<1x8x8xf32>
    "tpu.trace_stop"() : () -> ()
    %cst_45 = arith.constant dense<0xFF800000> : vector<1x8xf32>
    %91 = vector.multi_reduction <maximumf>, %90, %cst_45 [2] : vector<1x8x8xf32> to vector<1x8xf32>
    %92 = vector.shape_cast %91 : vector<1x8xf32> to vector<1x8x1xf32>
    %93 = vector.broadcast %92 : vector<1x8x1xf32> to vector<1x8x8xf32>
    %94 = arith.subf %90, %93 : vector<1x8x8xf32>
    %95 = math.exp %94 : vector<1x8x8xf32>
    %cst_46 = arith.constant dense<0.000000e+00> : vector<1x8xf32>
    %96 = vector.multi_reduction <add>, %95, %cst_46 [2] : vector<1x8x8xf32> to vector<1x8xf32>
    %97 = vector.shape_cast %96 : vector<1x8xf32> to vector<1x8x1xf32>
    %98 = tpu.reciprocal %97 {approx = true} : vector<1x8x1xf32> -> vector<1x8x1xf32>
    %99 = vector.broadcast %98 : vector<1x8x1xf32> to vector<1x8x8xf32>
    %100 = arith.mulf %95, %99 : vector<1x8x8xf32>
    %101 = arith.truncf %100 : vector<1x8x8xf32> to vector<1x8x8xbf16>
    %102 = vector.extract_strided_slice %42 {offsets = [0, 0, 16], sizes = [1, 8, 8], strides = [1, 1, 1]} : vector<1x8x32xbf16> to vector<1x8x8xbf16>
    "tpu.trace_start"() <{level = 10 : i32, message = "bqk,bkd->bqd"}> : () -> ()
    %cst_47 = arith.constant dense<0.000000e+00> : vector<1x8x8xf32>
    %103 = tpu.matmul %101, %102, %cst_47 {dimension_numbers = #tpu.dot_dimension_numbers<[2], [1], [1], [2], [0, 0, 0, 1, 1, 2], [0], [0]>} : vector<1x8x8xbf16>, vector<1x8x8xbf16>, vector<1x8x8xf32> -> vector<1x8x8xf32>
    "tpu.trace_stop"() : () -> ()
    %104 = vector.shape_cast %103 : vector<1x8x8xf32> to vector<8x8xf32>
    %105 = arith.truncf %104 : vector<8x8xf32> to vector<8x8xbf16>
    %106 = vector.extract_strided_slice %44 {offsets = [16, 0], sizes = [8, 32], strides = [1, 1]} : vector<32x32xbf16> to vector<8x32xbf16>
    %cst_48 = arith.constant dense<0.000000e+00> : vector<8x32xf32>
    %107 = tpu.matmul %105, %106, %cst_48 {dimension_numbers = #tpu.dot_dimension_numbers<[1], [0], [0], [1], [0, 0, 1, 1], [], []>} : vector<8x8xbf16>, vector<8x32xbf16>, vector<8x32xf32> -> vector<8x32xf32>
    %108 = arith.addf %87, %107 : vector<8x32xf32>
    %109 = vector.extract_strided_slice %38 {offsets = [0, 0, 24], sizes = [1, 8, 8], strides = [1, 1, 1]} : vector<1x8x32xbf16> to vector<1x8x8xbf16>
    %110 = vector.extract_strided_slice %40 {offsets = [0, 0, 24], sizes = [1, 8, 8], strides = [1, 1, 1]} : vector<1x8x32xbf16> to vector<1x8x8xbf16>
    "tpu.trace_start"() <{level = 10 : i32, message = "bqd,bkd->bqk"}> : () -> ()
    %cst_49 = arith.constant dense<0.000000e+00> : vector<1x8x8xf32>
    %111 = tpu.matmul %109, %110, %cst_49 {dimension_numbers = #tpu.dot_dimension_numbers<[2], [2], [1], [1], [0, 0, 0, 1, 1, 1], [0], [0]>} : vector<1x8x8xbf16>, vector<1x8x8xbf16>, vector<1x8x8xf32> -> vector<1x8x8xf32>
    "tpu.trace_stop"() : () -> ()
    %cst_50 = arith.constant dense<0xFF800000> : vector<1x8xf32>
    %112 = vector.multi_reduction <maximumf>, %111, %cst_50 [2] : vector<1x8x8xf32> to vector<1x8xf32>
    %113 = vector.shape_cast %112 : vector<1x8xf32> to vector<1x8x1xf32>
    %114 = vector.broadcast %113 : vector<1x8x1xf32> to vector<1x8x8xf32>
    %115 = arith.subf %111, %114 : vector<1x8x8xf32>
    %116 = math.exp %115 : vector<1x8x8xf32>
    %cst_51 = arith.constant dense<0.000000e+00> : vector<1x8xf32>
    %117 = vector.multi_reduction <add>, %116, %cst_51 [2] : vector<1x8x8xf32> to vector<1x8xf32>
    %118 = vector.shape_cast %117 : vector<1x8xf32> to vector<1x8x1xf32>
    %119 = tpu.reciprocal %118 {approx = true} : vector<1x8x1xf32> -> vector<1x8x1xf32>
    %120 = vector.broadcast %119 : vector<1x8x1xf32> to vector<1x8x8xf32>
    %121 = arith.mulf %116, %120 : vector<1x8x8xf32>
    %122 = arith.truncf %121 : vector<1x8x8xf32> to vector<1x8x8xbf16>
    %123 = vector.extract_strided_slice %42 {offsets = [0, 0, 24], sizes = [1, 8, 8], strides = [1, 1, 1]} : vector<1x8x32xbf16> to vector<1x8x8xbf16>
    "tpu.trace_start"() <{level = 10 : i32, message = "bqk,bkd->bqd"}> : () -> ()
    %cst_52 = arith.constant dense<0.000000e+00> : vector<1x8x8xf32>
    %124 = tpu.matmul %122, %123, %cst_52 {dimension_numbers = #tpu.dot_dimension_numbers<[2], [1], [1], [2], [0, 0, 0, 1, 1, 2], [0], [0]>} : vector<1x8x8xbf16>, vector<1x8x8xbf16>, vector<1x8x8xf32> -> vector<1x8x8xf32>
    "tpu.trace_stop"() : () -> ()
    %125 = vector.shape_cast %124 : vector<1x8x8xf32> to vector<8x8xf32>
    %126 = arith.truncf %125 : vector<8x8xf32> to vector<8x8xbf16>
    %127 = vector.extract_strided_slice %44 {offsets = [24, 0], sizes = [8, 32], strides = [1, 1]} : vector<32x32xbf16> to vector<8x32xbf16>
    %cst_53 = arith.constant dense<0.000000e+00> : vector<8x32xf32>
    %128 = tpu.matmul %126, %127, %cst_53 {dimension_numbers = #tpu.dot_dimension_numbers<[1], [0], [0], [1], [0, 0, 1, 1], [], []>} : vector<8x8xbf16>, vector<8x32xbf16>, vector<8x32xf32> -> vector<8x32xf32>
    %129 = arith.addf %108, %128 : vector<8x32xf32>
    %130 = arith.addf %12, %129 : vector<8x32xf32>
    %c0_54 = arith.constant 0 : index
    %c0_55 = arith.constant 0 : index
    %c0_56 = arith.constant 0 : index
    %131 = vector.load %arg12[%c0_54, %c0_55, %c0_56] : memref<2x1x32xf32, #tpu.memory_space<vmem>>, vector<1x1x32xf32>
    %132 = vector.shape_cast %131 : vector<1x1x32xf32> to vector<1x32xf32>
    %133 = vector.broadcast %132 : vector<1x32xf32> to vector<8x32xf32>
    %134 = arith.addf %130, %133 : vector<8x32xf32>
    %c0_57 = arith.constant 0 : index
    %c0_58 = arith.constant 0 : index
    %c0_59 = arith.constant 0 : index
    %135 = vector.load %arg13[%c0_57, %c0_58, %c0_59] : memref<2x1x32xf32, #tpu.memory_space<vmem>>, vector<1x1x32xf32>
    %136 = vector.shape_cast %135 : vector<1x1x32xf32> to vector<1x32xf32>
    %c0_60 = arith.constant 0 : index
    %c0_61 = arith.constant 0 : index
    %c0_62 = arith.constant 0 : index
    %137 = vector.load %arg14[%c0_60, %c0_61, %c0_62] : memref<2x1x32xf32, #tpu.memory_space<vmem>>, vector<1x1x32xf32>
    %138 = vector.shape_cast %137 : vector<1x1x32xf32> to vector<1x32xf32>
    %cst_63 = arith.constant dense<0.000000e+00> : vector<8xf32>
    %139 = vector.multi_reduction <add>, %134, %cst_63 [1] : vector<8x32xf32> to vector<8xf32>
    %140 = vector.shape_cast %139 : vector<8xf32> to vector<8x1xf32>
    %cst_64 = arith.constant 3.200000e+01 : f32
    %141 = vector.broadcast %cst_64 : f32 to vector<8x1xf32>
    %142 = arith.divf %140, %141 : vector<8x1xf32>
    %143 = vector.broadcast %142 : vector<8x1xf32> to vector<8x32xf32>
    %144 = arith.subf %134, %143 : vector<8x32xf32>
    %145 = arith.mulf %144, %144 : vector<8x32xf32>
    %cst_65 = arith.constant dense<0.000000e+00> : vector<8xf32>
    %146 = vector.multi_reduction <add>, %145, %cst_65 [1] : vector<8x32xf32> to vector<8xf32>
    %147 = vector.shape_cast %146 : vector<8xf32> to vector<8x1xf32>
    %cst_66 = arith.constant 3.200000e+01 : f32
    %148 = vector.broadcast %cst_66 : f32 to vector<8x1xf32>
    %149 = arith.divf %147, %148 : vector<8x1xf32>
    %150 = vector.broadcast %142 : vector<8x1xf32> to vector<8x32xf32>
    %151 = arith.subf %134, %150 : vector<8x32xf32>
    %cst_67 = arith.constant 9.99999974E-6 : f32
    %152 = vector.broadcast %cst_67 : f32 to vector<8x1xf32>
    %153 = arith.addf %149, %152 : vector<8x1xf32>
    %154 = math.rsqrt %153 : vector<8x1xf32>
    %155 = vector.broadcast %154 : vector<8x1xf32> to vector<8x32xf32>
    %156 = arith.mulf %151, %155 : vector<8x32xf32>
    %157 = vector.broadcast %136 : vector<1x32xf32> to vector<8x32xf32>
    %158 = arith.mulf %156, %157 : vector<8x32xf32>
    %159 = vector.broadcast %138 : vector<1x32xf32> to vector<8x32xf32>
    %160 = arith.addf %158, %159 : vector<8x32xf32>
    %161 = arith.truncf %160 : vector<8x32xf32> to vector<8x32xbf16>
    %c0_68 = arith.constant 0 : index
    %c0_69 = arith.constant 0 : index
    %c0_70 = arith.constant 0 : index
    %162 = vector.load %arg15[%c0_68, %c0_69, %c0_70] : memref<2x32x64xbf16, #tpu.memory_space<vmem>>, vector<1x32x64xbf16>
    %163 = vector.shape_cast %162 : vector<1x32x64xbf16> to vector<32x64xbf16>
    %cst_71 = arith.constant dense<0.000000e+00> : vector<8x64xf32>
    %164 = tpu.matmul %161, %163, %cst_71 {dimension_numbers = #tpu.dot_dimension_numbers<[1], [0], [0], [1], [0, 0, 1, 1], [], []>} : vector<8x32xbf16>, vector<32x64xbf16>, vector<8x64xf32> -> vector<8x64xf32>
    %c0_72 = arith.constant 0 : index
    %c0_73 = arith.constant 0 : index
    %c0_74 = arith.constant 0 : index
    %165 = vector.load %arg16[%c0_72, %c0_73, %c0_74] : memref<2x1x64xf32, #tpu.memory_space<vmem>>, vector<1x1x64xf32>
    %166 = vector.shape_cast %165 : vector<1x1x64xf32> to vector<1x64xf32>
    %167 = vector.broadcast %166 : vector<1x64xf32> to vector<8x64xf32>
    %168 = arith.addf %164, %167 : vector<8x64xf32>
    %cst_75 = arith.constant 0.000000e+00 : f32
    %169 = vector.broadcast %cst_75 : f32 to vector<8x64xf32>
    %170 = arith.maximumf %168, %169 : vector<8x64xf32>
    %171 = arith.truncf %170 : vector<8x64xf32> to vector<8x64xbf16>
    %c0_76 = arith.constant 0 : index
    %c0_77 = arith.constant 0 : index
    %c0_78 = arith.constant 0 : index
    %172 = vector.load %arg17[%c0_76, %c0_77, %c0_78] : memref<2x64x32xbf16, #tpu.memory_space<vmem>>, vector<1x64x32xbf16>
    %173 = vector.shape_cast %172 : vector<1x64x32xbf16> to vector<64x32xbf16>
    %cst_79 = arith.constant dense<0.000000e+00> : vector<8x32xf32>
    %174 = tpu.matmul %171, %173, %cst_79 {dimension_numbers = #tpu.dot_dimension_numbers<[1], [0], [0], [1], [0, 0, 1, 1], [], []>} : vector<8x64xbf16>, vector<64x32xbf16>, vector<8x32xf32> -> vector<8x32xf32>
    %c0_80 = arith.constant 0 : index
    %c0_81 = arith.constant 0 : index
    %c0_82 = arith.constant 0 : index
    %175 = vector.load %arg18[%c0_80, %c0_81, %c0_82] : memref<2x1x32xf32, #tpu.memory_space<vmem>>, vector<1x1x32xf32>
    %176 = vector.shape_cast %175 : vector<1x1x32xf32> to vector<1x32xf32>
    %177 = vector.broadcast %176 : vector<1x32xf32> to vector<8x32xf32>
    %178 = arith.addf %174, %177 : vector<8x32xf32>
    %179 = arith.addf %160, %178 : vector<8x32xf32>
    %c0_83 = arith.constant 0 : index
    %c0_84 = arith.constant 0 : index
    %c0_85 = arith.constant 0 : index
    %180 = vector.load %arg19[%c0_83, %c0_84, %c0_85] : memref<2x1x32xf32, #tpu.memory_space<vmem>>, vector<1x1x32xf32>
    %181 = vector.shape_cast %180 : vector<1x1x32xf32> to vector<1x32xf32>
    %c0_86 = arith.constant 0 : index
    %c0_87 = arith.constant 0 : index
    %c0_88 = arith.constant 0 : index
    %182 = vector.load %arg20[%c0_86, %c0_87, %c0_88] : memref<2x1x32xf32, #tpu.memory_space<vmem>>, vector<1x1x32xf32>
    %183 = vector.shape_cast %182 : vector<1x1x32xf32> to vector<1x32xf32>
    %cst_89 = arith.constant dense<0.000000e+00> : vector<8xf32>
    %184 = vector.multi_reduction <add>, %179, %cst_89 [1] : vector<8x32xf32> to vector<8xf32>
    %185 = vector.shape_cast %184 : vector<8xf32> to vector<8x1xf32>
    %cst_90 = arith.constant 3.200000e+01 : f32
    %186 = vector.broadcast %cst_90 : f32 to vector<8x1xf32>
    %187 = arith.divf %185, %186 : vector<8x1xf32>
    %188 = vector.broadcast %187 : vector<8x1xf32> to vector<8x32xf32>
    %189 = arith.subf %179, %188 : vector<8x32xf32>
    %190 = arith.mulf %189, %189 : vector<8x32xf32>
    %cst_91 = arith.constant dense<0.000000e+00> : vector<8xf32>
    %191 = vector.multi_reduction <add>, %190, %cst_91 [1] : vector<8x32xf32> to vector<8xf32>
    %192 = vector.shape_cast %191 : vector<8xf32> to vector<8x1xf32>
    %cst_92 = arith.constant 3.200000e+01 : f32
    %193 = vector.broadcast %cst_92 : f32 to vector<8x1xf32>
    %194 = arith.divf %192, %193 : vector<8x1xf32>
    %195 = vector.broadcast %187 : vector<8x1xf32> to vector<8x32xf32>
    %196 = arith.subf %179, %195 : vector<8x32xf32>
    %cst_93 = arith.constant 9.99999974E-6 : f32
    %197 = vector.broadcast %cst_93 : f32 to vector<8x1xf32>
    %198 = arith.addf %194, %197 : vector<8x1xf32>
    %199 = math.rsqrt %198 : vector<8x1xf32>
    %200 = vector.broadcast %199 : vector<8x1xf32> to vector<8x32xf32>
    %201 = arith.mulf %196, %200 : vector<8x32xf32>
    %202 = vector.broadcast %181 : vector<1x32xf32> to vector<8x32xf32>
    %203 = arith.mulf %201, %202 : vector<8x32xf32>
    %204 = vector.broadcast %183 : vector<1x32xf32> to vector<8x32xf32>
    %205 = arith.addf %203, %204 : vector<8x32xf32>
    %206 = arith.truncf %205 : vector<8x32xf32> to vector<8x32xbf16>
    %c1 = arith.constant 1 : index
    %c0_94 = arith.constant 0 : index
    %c0_95 = arith.constant 0 : index
    %207 = vector.load %arg5[%c1, %c0_94, %c0_95] : memref<2x32x32xbf16, #tpu.memory_space<vmem>>, vector<1x32x32xbf16>
    %208 = vector.shape_cast %207 : vector<1x32x32xbf16> to vector<32x32xbf16>
    %cst_96 = arith.constant dense<0.000000e+00> : vector<8x32xf32>
    %209 = tpu.matmul %206, %208, %cst_96 {dimension_numbers = #tpu.dot_dimension_numbers<[1], [0], [0], [1], [0, 0, 1, 1], [], []>} : vector<8x32xbf16>, vector<32x32xbf16>, vector<8x32xf32> -> vector<8x32xf32>
    %c1_97 = arith.constant 1 : index
    %c0_98 = arith.constant 0 : index
    %c0_99 = arith.constant 0 : index
    %210 = vector.load %arg6[%c1_97, %c0_98, %c0_99] : memref<2x1x32xf32, #tpu.memory_space<vmem>>, vector<1x1x32xf32>
    %211 = vector.shape_cast %210 : vector<1x1x32xf32> to vector<1x32xf32>
    %212 = vector.broadcast %211 : vector<1x32xf32> to vector<8x32xf32>
    %213 = arith.addf %209, %212 : vector<8x32xf32>
    %c1_100 = arith.constant 1 : index
    %c0_101 = arith.constant 0 : index
    %c0_102 = arith.constant 0 : index
    %214 = vector.load %arg7[%c1_100, %c0_101, %c0_102] : memref<2x32x32xbf16, #tpu.memory_space<vmem>>, vector<1x32x32xbf16>
    %215 = vector.shape_cast %214 : vector<1x32x32xbf16> to vector<32x32xbf16>
    %cst_103 = arith.constant dense<0.000000e+00> : vector<8x32xf32>
    %216 = tpu.matmul %206, %215, %cst_103 {dimension_numbers = #tpu.dot_dimension_numbers<[1], [0], [0], [1], [0, 0, 1, 1], [], []>} : vector<8x32xbf16>, vector<32x32xbf16>, vector<8x32xf32> -> vector<8x32xf32>
    %c1_104 = arith.constant 1 : index
    %c0_105 = arith.constant 0 : index
    %c0_106 = arith.constant 0 : index
    %217 = vector.load %arg8[%c1_104, %c0_105, %c0_106] : memref<2x1x32xf32, #tpu.memory_space<vmem>>, vector<1x1x32xf32>
    %218 = vector.shape_cast %217 : vector<1x1x32xf32> to vector<1x32xf32>
    %219 = vector.broadcast %218 : vector<1x32xf32> to vector<8x32xf32>
    %220 = arith.addf %216, %219 : vector<8x32xf32>
    %c1_107 = arith.constant 1 : index
    %c0_108 = arith.constant 0 : index
    %c0_109 = arith.constant 0 : index
    %221 = vector.load %arg9[%c1_107, %c0_108, %c0_109] : memref<2x32x32xbf16, #tpu.memory_space<vmem>>, vector<1x32x32xbf16>
    %222 = vector.shape_cast %221 : vector<1x32x32xbf16> to vector<32x32xbf16>
    %cst_110 = arith.constant dense<0.000000e+00> : vector<8x32xf32>
    %223 = tpu.matmul %206, %222, %cst_110 {dimension_numbers = #tpu.dot_dimension_numbers<[1], [0], [0], [1], [0, 0, 1, 1], [], []>} : vector<8x32xbf16>, vector<32x32xbf16>, vector<8x32xf32> -> vector<8x32xf32>
    %c1_111 = arith.constant 1 : index
    %c0_112 = arith.constant 0 : index
    %c0_113 = arith.constant 0 : index
    %224 = vector.load %arg10[%c1_111, %c0_112, %c0_113] : memref<2x1x32xf32, #tpu.memory_space<vmem>>, vector<1x1x32xf32>
    %225 = vector.shape_cast %224 : vector<1x1x32xf32> to vector<1x32xf32>
    %226 = vector.broadcast %225 : vector<1x32xf32> to vector<8x32xf32>
    %227 = arith.addf %223, %226 : vector<8x32xf32>
    %cst_114 = arith.constant 0.353553385 : f32
    %228 = vector.broadcast %cst_114 : f32 to vector<8x32xf32>
    %229 = arith.mulf %213, %228 : vector<8x32xf32>
    %230 = vector.shape_cast %229 : vector<8x32xf32> to vector<1x8x32xf32>
    %231 = arith.truncf %230 : vector<1x8x32xf32> to vector<1x8x32xbf16>
    %232 = vector.shape_cast %220 : vector<8x32xf32> to vector<1x8x32xf32>
    %233 = arith.truncf %232 : vector<1x8x32xf32> to vector<1x8x32xbf16>
    %234 = vector.shape_cast %227 : vector<8x32xf32> to vector<1x8x32xf32>
    %235 = arith.truncf %234 : vector<1x8x32xf32> to vector<1x8x32xbf16>
    %c1_115 = arith.constant 1 : index
    %c0_116 = arith.constant 0 : index
    %c0_117 = arith.constant 0 : index
    %236 = vector.load %arg11[%c1_115, %c0_116, %c0_117] : memref<2x32x32xbf16, #tpu.memory_space<vmem>>, vector<1x32x32xbf16>
    %237 = vector.shape_cast %236 : vector<1x32x32xbf16> to vector<32x32xbf16>
    %cst_118 = arith.constant 0.000000e+00 : f32
    %238 = vector.broadcast %cst_118 : f32 to vector<8x32xf32>
    %239 = vector.extract_strided_slice %231 {offsets = [0, 0, 0], sizes = [1, 8, 8], strides = [1, 1, 1]} : vector<1x8x32xbf16> to vector<1x8x8xbf16>
    %240 = vector.extract_strided_slice %233 {offsets = [0, 0, 0], sizes = [1, 8, 8], strides = [1, 1, 1]} : vector<1x8x32xbf16> to vector<1x8x8xbf16>
    "tpu.trace_start"() <{level = 10 : i32, message = "bqd,bkd->bqk"}> : () -> ()
    %cst_119 = arith.constant dense<0.000000e+00> : vector<1x8x8xf32>
    %241 = tpu.matmul %239, %240, %cst_119 {dimension_numbers = #tpu.dot_dimension_numbers<[2], [2], [1], [1], [0, 0, 0, 1, 1, 1], [0], [0]>} : vector<1x8x8xbf16>, vector<1x8x8xbf16>, vector<1x8x8xf32> -> vector<1x8x8xf32>
    "tpu.trace_stop"() : () -> ()
    %cst_120 = arith.constant dense<0xFF800000> : vector<1x8xf32>
    %242 = vector.multi_reduction <maximumf>, %241, %cst_120 [2] : vector<1x8x8xf32> to vector<1x8xf32>
    %243 = vector.shape_cast %242 : vector<1x8xf32> to vector<1x8x1xf32>
    %244 = vector.broadcast %243 : vector<1x8x1xf32> to vector<1x8x8xf32>
    %245 = arith.subf %241, %244 : vector<1x8x8xf32>
    %246 = math.exp %245 : vector<1x8x8xf32>
    %cst_121 = arith.constant dense<0.000000e+00> : vector<1x8xf32>
    %247 = vector.multi_reduction <add>, %246, %cst_121 [2] : vector<1x8x8xf32> to vector<1x8xf32>
    %248 = vector.shape_cast %247 : vector<1x8xf32> to vector<1x8x1xf32>
    %249 = tpu.reciprocal %248 {approx = true} : vector<1x8x1xf32> -> vector<1x8x1xf32>
    %250 = vector.broadcast %249 : vector<1x8x1xf32> to vector<1x8x8xf32>
    %251 = arith.mulf %246, %250 : vector<1x8x8xf32>
    %252 = arith.truncf %251 : vector<1x8x8xf32> to vector<1x8x8xbf16>
    %253 = vector.extract_strided_slice %235 {offsets = [0, 0, 0], sizes = [1, 8, 8], strides = [1, 1, 1]} : vector<1x8x32xbf16> to vector<1x8x8xbf16>
    "tpu.trace_start"() <{level = 10 : i32, message = "bqk,bkd->bqd"}> : () -> ()
    %cst_122 = arith.constant dense<0.000000e+00> : vector<1x8x8xf32>
    %254 = tpu.matmul %252, %253, %cst_122 {dimension_numbers = #tpu.dot_dimension_numbers<[2], [1], [1], [2], [0, 0, 0, 1, 1, 2], [0], [0]>} : vector<1x8x8xbf16>, vector<1x8x8xbf16>, vector<1x8x8xf32> -> vector<1x8x8xf32>
    "tpu.trace_stop"() : () -> ()
    %255 = vector.shape_cast %254 : vector<1x8x8xf32> to vector<8x8xf32>
    %256 = arith.truncf %255 : vector<8x8xf32> to vector<8x8xbf16>
    %257 = vector.extract_strided_slice %237 {offsets = [0, 0], sizes = [8, 32], strides = [1, 1]} : vector<32x32xbf16> to vector<8x32xbf16>
    %cst_123 = arith.constant dense<0.000000e+00> : vector<8x32xf32>
    %258 = tpu.matmul %256, %257, %cst_123 {dimension_numbers = #tpu.dot_dimension_numbers<[1], [0], [0], [1], [0, 0, 1, 1], [], []>} : vector<8x8xbf16>, vector<8x32xbf16>, vector<8x32xf32> -> vector<8x32xf32>
    %259 = arith.addf %238, %258 : vector<8x32xf32>
    %260 = vector.extract_strided_slice %231 {offsets = [0, 0, 8], sizes = [1, 8, 8], strides = [1, 1, 1]} : vector<1x8x32xbf16> to vector<1x8x8xbf16>
    %261 = vector.extract_strided_slice %233 {offsets = [0, 0, 8], sizes = [1, 8, 8], strides = [1, 1, 1]} : vector<1x8x32xbf16> to vector<1x8x8xbf16>
    "tpu.trace_start"() <{level = 10 : i32, message = "bqd,bkd->bqk"}> : () -> ()
    %cst_124 = arith.constant dense<0.000000e+00> : vector<1x8x8xf32>
    %262 = tpu.matmul %260, %261, %cst_124 {dimension_numbers = #tpu.dot_dimension_numbers<[2], [2], [1], [1], [0, 0, 0, 1, 1, 1], [0], [0]>} : vector<1x8x8xbf16>, vector<1x8x8xbf16>, vector<1x8x8xf32> -> vector<1x8x8xf32>
    "tpu.trace_stop"() : () -> ()
    %cst_125 = arith.constant dense<0xFF800000> : vector<1x8xf32>
    %263 = vector.multi_reduction <maximumf>, %262, %cst_125 [2] : vector<1x8x8xf32> to vector<1x8xf32>
    %264 = vector.shape_cast %263 : vector<1x8xf32> to vector<1x8x1xf32>
    %265 = vector.broadcast %264 : vector<1x8x1xf32> to vector<1x8x8xf32>
    %266 = arith.subf %262, %265 : vector<1x8x8xf32>
    %267 = math.exp %266 : vector<1x8x8xf32>
    %cst_126 = arith.constant dense<0.000000e+00> : vector<1x8xf32>
    %268 = vector.multi_reduction <add>, %267, %cst_126 [2] : vector<1x8x8xf32> to vector<1x8xf32>
    %269 = vector.shape_cast %268 : vector<1x8xf32> to vector<1x8x1xf32>
    %270 = tpu.reciprocal %269 {approx = true} : vector<1x8x1xf32> -> vector<1x8x1xf32>
    %271 = vector.broadcast %270 : vector<1x8x1xf32> to vector<1x8x8xf32>
    %272 = arith.mulf %267, %271 : vector<1x8x8xf32>
    %273 = arith.truncf %272 : vector<1x8x8xf32> to vector<1x8x8xbf16>
    %274 = vector.extract_strided_slice %235 {offsets = [0, 0, 8], sizes = [1, 8, 8], strides = [1, 1, 1]} : vector<1x8x32xbf16> to vector<1x8x8xbf16>
    "tpu.trace_start"() <{level = 10 : i32, message = "bqk,bkd->bqd"}> : () -> ()
    %cst_127 = arith.constant dense<0.000000e+00> : vector<1x8x8xf32>
    %275 = tpu.matmul %273, %274, %cst_127 {dimension_numbers = #tpu.dot_dimension_numbers<[2], [1], [1], [2], [0, 0, 0, 1, 1, 2], [0], [0]>} : vector<1x8x8xbf16>, vector<1x8x8xbf16>, vector<1x8x8xf32> -> vector<1x8x8xf32>
    "tpu.trace_stop"() : () -> ()
    %276 = vector.shape_cast %275 : vector<1x8x8xf32> to vector<8x8xf32>
    %277 = arith.truncf %276 : vector<8x8xf32> to vector<8x8xbf16>
    %278 = vector.extract_strided_slice %237 {offsets = [8, 0], sizes = [8, 32], strides = [1, 1]} : vector<32x32xbf16> to vector<8x32xbf16>
    %cst_128 = arith.constant dense<0.000000e+00> : vector<8x32xf32>
    %279 = tpu.matmul %277, %278, %cst_128 {dimension_numbers = #tpu.dot_dimension_numbers<[1], [0], [0], [1], [0, 0, 1, 1], [], []>} : vector<8x8xbf16>, vector<8x32xbf16>, vector<8x32xf32> -> vector<8x32xf32>
    %280 = arith.addf %259, %279 : vector<8x32xf32>
    %281 = vector.extract_strided_slice %231 {offsets = [0, 0, 16], sizes = [1, 8, 8], strides = [1, 1, 1]} : vector<1x8x32xbf16> to vector<1x8x8xbf16>
    %282 = vector.extract_strided_slice %233 {offsets = [0, 0, 16], sizes = [1, 8, 8], strides = [1, 1, 1]} : vector<1x8x32xbf16> to vector<1x8x8xbf16>
    "tpu.trace_start"() <{level = 10 : i32, message = "bqd,bkd->bqk"}> : () -> ()
    %cst_129 = arith.constant dense<0.000000e+00> : vector<1x8x8xf32>
    %283 = tpu.matmul %281, %282, %cst_129 {dimension_numbers = #tpu.dot_dimension_numbers<[2], [2], [1], [1], [0, 0, 0, 1, 1, 1], [0], [0]>} : vector<1x8x8xbf16>, vector<1x8x8xbf16>, vector<1x8x8xf32> -> vector<1x8x8xf32>
    "tpu.trace_stop"() : () -> ()
    %cst_130 = arith.constant dense<0xFF800000> : vector<1x8xf32>
    %284 = vector.multi_reduction <maximumf>, %283, %cst_130 [2] : vector<1x8x8xf32> to vector<1x8xf32>
    %285 = vector.shape_cast %284 : vector<1x8xf32> to vector<1x8x1xf32>
    %286 = vector.broadcast %285 : vector<1x8x1xf32> to vector<1x8x8xf32>
    %287 = arith.subf %283, %286 : vector<1x8x8xf32>
    %288 = math.exp %287 : vector<1x8x8xf32>
    %cst_131 = arith.constant dense<0.000000e+00> : vector<1x8xf32>
    %289 = vector.multi_reduction <add>, %288, %cst_131 [2] : vector<1x8x8xf32> to vector<1x8xf32>
    %290 = vector.shape_cast %289 : vector<1x8xf32> to vector<1x8x1xf32>
    %291 = tpu.reciprocal %290 {approx = true} : vector<1x8x1xf32> -> vector<1x8x1xf32>
    %292 = vector.broadcast %291 : vector<1x8x1xf32> to vector<1x8x8xf32>
    %293 = arith.mulf %288, %292 : vector<1x8x8xf32>
    %294 = arith.truncf %293 : vector<1x8x8xf32> to vector<1x8x8xbf16>
    %295 = vector.extract_strided_slice %235 {offsets = [0, 0, 16], sizes = [1, 8, 8], strides = [1, 1, 1]} : vector<1x8x32xbf16> to vector<1x8x8xbf16>
    "tpu.trace_start"() <{level = 10 : i32, message = "bqk,bkd->bqd"}> : () -> ()
    %cst_132 = arith.constant dense<0.000000e+00> : vector<1x8x8xf32>
    %296 = tpu.matmul %294, %295, %cst_132 {dimension_numbers = #tpu.dot_dimension_numbers<[2], [1], [1], [2], [0, 0, 0, 1, 1, 2], [0], [0]>} : vector<1x8x8xbf16>, vector<1x8x8xbf16>, vector<1x8x8xf32> -> vector<1x8x8xf32>
    "tpu.trace_stop"() : () -> ()
    %297 = vector.shape_cast %296 : vector<1x8x8xf32> to vector<8x8xf32>
    %298 = arith.truncf %297 : vector<8x8xf32> to vector<8x8xbf16>
    %299 = vector.extract_strided_slice %237 {offsets = [16, 0], sizes = [8, 32], strides = [1, 1]} : vector<32x32xbf16> to vector<8x32xbf16>
    %cst_133 = arith.constant dense<0.000000e+00> : vector<8x32xf32>
    %300 = tpu.matmul %298, %299, %cst_133 {dimension_numbers = #tpu.dot_dimension_numbers<[1], [0], [0], [1], [0, 0, 1, 1], [], []>} : vector<8x8xbf16>, vector<8x32xbf16>, vector<8x32xf32> -> vector<8x32xf32>
    %301 = arith.addf %280, %300 : vector<8x32xf32>
    %302 = vector.extract_strided_slice %231 {offsets = [0, 0, 24], sizes = [1, 8, 8], strides = [1, 1, 1]} : vector<1x8x32xbf16> to vector<1x8x8xbf16>
    %303 = vector.extract_strided_slice %233 {offsets = [0, 0, 24], sizes = [1, 8, 8], strides = [1, 1, 1]} : vector<1x8x32xbf16> to vector<1x8x8xbf16>
    "tpu.trace_start"() <{level = 10 : i32, message = "bqd,bkd->bqk"}> : () -> ()
    %cst_134 = arith.constant dense<0.000000e+00> : vector<1x8x8xf32>
    %304 = tpu.matmul %302, %303, %cst_134 {dimension_numbers = #tpu.dot_dimension_numbers<[2], [2], [1], [1], [0, 0, 0, 1, 1, 1], [0], [0]>} : vector<1x8x8xbf16>, vector<1x8x8xbf16>, vector<1x8x8xf32> -> vector<1x8x8xf32>
    "tpu.trace_stop"() : () -> ()
    %cst_135 = arith.constant dense<0xFF800000> : vector<1x8xf32>
    %305 = vector.multi_reduction <maximumf>, %304, %cst_135 [2] : vector<1x8x8xf32> to vector<1x8xf32>
    %306 = vector.shape_cast %305 : vector<1x8xf32> to vector<1x8x1xf32>
    %307 = vector.broadcast %306 : vector<1x8x1xf32> to vector<1x8x8xf32>
    %308 = arith.subf %304, %307 : vector<1x8x8xf32>
    %309 = math.exp %308 : vector<1x8x8xf32>
    %cst_136 = arith.constant dense<0.000000e+00> : vector<1x8xf32>
    %310 = vector.multi_reduction <add>, %309, %cst_136 [2] : vector<1x8x8xf32> to vector<1x8xf32>
    %311 = vector.shape_cast %310 : vector<1x8xf32> to vector<1x8x1xf32>
    %312 = tpu.reciprocal %311 {approx = true} : vector<1x8x1xf32> -> vector<1x8x1xf32>
    %313 = vector.broadcast %312 : vector<1x8x1xf32> to vector<1x8x8xf32>
    %314 = arith.mulf %309, %313 : vector<1x8x8xf32>
    %315 = arith.truncf %314 : vector<1x8x8xf32> to vector<1x8x8xbf16>
    %316 = vector.extract_strided_slice %235 {offsets = [0, 0, 24], sizes = [1, 8, 8], strides = [1, 1, 1]} : vector<1x8x32xbf16> to vector<1x8x8xbf16>
    "tpu.trace_start"() <{level = 10 : i32, message = "bqk,bkd->bqd"}> : () -> ()
    %cst_137 = arith.constant dense<0.000000e+00> : vector<1x8x8xf32>
    %317 = tpu.matmul %315, %316, %cst_137 {dimension_numbers = #tpu.dot_dimension_numbers<[2], [1], [1], [2], [0, 0, 0, 1, 1, 2], [0], [0]>} : vector<1x8x8xbf16>, vector<1x8x8xbf16>, vector<1x8x8xf32> -> vector<1x8x8xf32>
    "tpu.trace_stop"() : () -> ()
    %318 = vector.shape_cast %317 : vector<1x8x8xf32> to vector<8x8xf32>
    %319 = arith.truncf %318 : vector<8x8xf32> to vector<8x8xbf16>
    %320 = vector.extract_strided_slice %237 {offsets = [24, 0], sizes = [8, 32], strides = [1, 1]} : vector<32x32xbf16> to vector<8x32xbf16>
    %cst_138 = arith.constant dense<0.000000e+00> : vector<8x32xf32>
    %321 = tpu.matmul %319, %320, %cst_138 {dimension_numbers = #tpu.dot_dimension_numbers<[1], [0], [0], [1], [0, 0, 1, 1], [], []>} : vector<8x8xbf16>, vector<8x32xbf16>, vector<8x32xf32> -> vector<8x32xf32>
    %322 = arith.addf %301, %321 : vector<8x32xf32>
    %323 = arith.addf %205, %322 : vector<8x32xf32>
    %c1_139 = arith.constant 1 : index
    %c0_140 = arith.constant 0 : index
    %c0_141 = arith.constant 0 : index
    %324 = vector.load %arg12[%c1_139, %c0_140, %c0_141] : memref<2x1x32xf32, #tpu.memory_space<vmem>>, vector<1x1x32xf32>
    %325 = vector.shape_cast %324 : vector<1x1x32xf32> to vector<1x32xf32>
    %326 = vector.broadcast %325 : vector<1x32xf32> to vector<8x32xf32>
    %327 = arith.addf %323, %326 : vector<8x32xf32>
    %c1_142 = arith.constant 1 : index
    %c0_143 = arith.constant 0 : index
    %c0_144 = arith.constant 0 : index
    %328 = vector.load %arg13[%c1_142, %c0_143, %c0_144] : memref<2x1x32xf32, #tpu.memory_space<vmem>>, vector<1x1x32xf32>
    %329 = vector.shape_cast %328 : vector<1x1x32xf32> to vector<1x32xf32>
    %c1_145 = arith.constant 1 : index
    %c0_146 = arith.constant 0 : index
    %c0_147 = arith.constant 0 : index
    %330 = vector.load %arg14[%c1_145, %c0_146, %c0_147] : memref<2x1x32xf32, #tpu.memory_space<vmem>>, vector<1x1x32xf32>
    %331 = vector.shape_cast %330 : vector<1x1x32xf32> to vector<1x32xf32>
    %cst_148 = arith.constant dense<0.000000e+00> : vector<8xf32>
    %332 = vector.multi_reduction <add>, %327, %cst_148 [1] : vector<8x32xf32> to vector<8xf32>
    %333 = vector.shape_cast %332 : vector<8xf32> to vector<8x1xf32>
    %cst_149 = arith.constant 3.200000e+01 : f32
    %334 = vector.broadcast %cst_149 : f32 to vector<8x1xf32>
    %335 = arith.divf %333, %334 : vector<8x1xf32>
    %336 = vector.broadcast %335 : vector<8x1xf32> to vector<8x32xf32>
    %337 = arith.subf %327, %336 : vector<8x32xf32>
    %338 = arith.mulf %337, %337 : vector<8x32xf32>
    %cst_150 = arith.constant dense<0.000000e+00> : vector<8xf32>
    %339 = vector.multi_reduction <add>, %338, %cst_150 [1] : vector<8x32xf32> to vector<8xf32>
    %340 = vector.shape_cast %339 : vector<8xf32> to vector<8x1xf32>
    %cst_151 = arith.constant 3.200000e+01 : f32
    %341 = vector.broadcast %cst_151 : f32 to vector<8x1xf32>
    %342 = arith.divf %340, %341 : vector<8x1xf32>
    %343 = vector.broadcast %335 : vector<8x1xf32> to vector<8x32xf32>
    %344 = arith.subf %327, %343 : vector<8x32xf32>
    %cst_152 = arith.constant 9.99999974E-6 : f32
    %345 = vector.broadcast %cst_152 : f32 to vector<8x1xf32>
    %346 = arith.addf %342, %345 : vector<8x1xf32>
    %347 = math.rsqrt %346 : vector<8x1xf32>
    %348 = vector.broadcast %347 : vector<8x1xf32> to vector<8x32xf32>
    %349 = arith.mulf %344, %348 : vector<8x32xf32>
    %350 = vector.broadcast %329 : vector<1x32xf32> to vector<8x32xf32>
    %351 = arith.mulf %349, %350 : vector<8x32xf32>
    %352 = vector.broadcast %331 : vector<1x32xf32> to vector<8x32xf32>
    %353 = arith.addf %351, %352 : vector<8x32xf32>
    %354 = arith.truncf %353 : vector<8x32xf32> to vector<8x32xbf16>
    %c1_153 = arith.constant 1 : index
    %c0_154 = arith.constant 0 : index
    %c0_155 = arith.constant 0 : index
    %355 = vector.load %arg15[%c1_153, %c0_154, %c0_155] : memref<2x32x64xbf16, #tpu.memory_space<vmem>>, vector<1x32x64xbf16>
    %356 = vector.shape_cast %355 : vector<1x32x64xbf16> to vector<32x64xbf16>
    %cst_156 = arith.constant dense<0.000000e+00> : vector<8x64xf32>
    %357 = tpu.matmul %354, %356, %cst_156 {dimension_numbers = #tpu.dot_dimension_numbers<[1], [0], [0], [1], [0, 0, 1, 1], [], []>} : vector<8x32xbf16>, vector<32x64xbf16>, vector<8x64xf32> -> vector<8x64xf32>
    %c1_157 = arith.constant 1 : index
    %c0_158 = arith.constant 0 : index
    %c0_159 = arith.constant 0 : index
    %358 = vector.load %arg16[%c1_157, %c0_158, %c0_159] : memref<2x1x64xf32, #tpu.memory_space<vmem>>, vector<1x1x64xf32>
    %359 = vector.shape_cast %358 : vector<1x1x64xf32> to vector<1x64xf32>
    %360 = vector.broadcast %359 : vector<1x64xf32> to vector<8x64xf32>
    %361 = arith.addf %357, %360 : vector<8x64xf32>
    %cst_160 = arith.constant 0.000000e+00 : f32
    %362 = vector.broadcast %cst_160 : f32 to vector<8x64xf32>
    %363 = arith.maximumf %361, %362 : vector<8x64xf32>
    %364 = arith.truncf %363 : vector<8x64xf32> to vector<8x64xbf16>
    %c1_161 = arith.constant 1 : index
    %c0_162 = arith.constant 0 : index
    %c0_163 = arith.constant 0 : index
    %365 = vector.load %arg17[%c1_161, %c0_162, %c0_163] : memref<2x64x32xbf16, #tpu.memory_space<vmem>>, vector<1x64x32xbf16>
    %366 = vector.shape_cast %365 : vector<1x64x32xbf16> to vector<64x32xbf16>
    %cst_164 = arith.constant dense<0.000000e+00> : vector<8x32xf32>
    %367 = tpu.matmul %364, %366, %cst_164 {dimension_numbers = #tpu.dot_dimension_numbers<[1], [0], [0], [1], [0, 0, 1, 1], [], []>} : vector<8x64xbf16>, vector<64x32xbf16>, vector<8x32xf32> -> vector<8x32xf32>
    %c1_165 = arith.constant 1 : index
    %c0_166 = arith.constant 0 : index
    %c0_167 = arith.constant 0 : index
    %368 = vector.load %arg18[%c1_165, %c0_166, %c0_167] : memref<2x1x32xf32, #tpu.memory_space<vmem>>, vector<1x1x32xf32>
    %369 = vector.shape_cast %368 : vector<1x1x32xf32> to vector<1x32xf32>
    %370 = vector.broadcast %369 : vector<1x32xf32> to vector<8x32xf32>
    %371 = arith.addf %367, %370 : vector<8x32xf32>
    %372 = arith.addf %353, %371 : vector<8x32xf32>
    %c1_168 = arith.constant 1 : index
    %c0_169 = arith.constant 0 : index
    %c0_170 = arith.constant 0 : index
    %373 = vector.load %arg19[%c1_168, %c0_169, %c0_170] : memref<2x1x32xf32, #tpu.memory_space<vmem>>, vector<1x1x32xf32>
    %374 = vector.shape_cast %373 : vector<1x1x32xf32> to vector<1x32xf32>
    %c1_171 = arith.constant 1 : index
    %c0_172 = arith.constant 0 : index
    %c0_173 = arith.constant 0 : index
    %375 = vector.load %arg20[%c1_171, %c0_172, %c0_173] : memref<2x1x32xf32, #tpu.memory_space<vmem>>, vector<1x1x32xf32>
    %376 = vector.shape_cast %375 : vector<1x1x32xf32> to vector<1x32xf32>
    %cst_174 = arith.constant dense<0.000000e+00> : vector<8xf32>
    %377 = vector.multi_reduction <add>, %372, %cst_174 [1] : vector<8x32xf32> to vector<8xf32>
    %378 = vector.shape_cast %377 : vector<8xf32> to vector<8x1xf32>
    %cst_175 = arith.constant 3.200000e+01 : f32
    %379 = vector.broadcast %cst_175 : f32 to vector<8x1xf32>
    %380 = arith.divf %378, %379 : vector<8x1xf32>
    %381 = vector.broadcast %380 : vector<8x1xf32> to vector<8x32xf32>
    %382 = arith.subf %372, %381 : vector<8x32xf32>
    %383 = arith.mulf %382, %382 : vector<8x32xf32>
    %cst_176 = arith.constant dense<0.000000e+00> : vector<8xf32>
    %384 = vector.multi_reduction <add>, %383, %cst_176 [1] : vector<8x32xf32> to vector<8xf32>
    %385 = vector.shape_cast %384 : vector<8xf32> to vector<8x1xf32>
    %cst_177 = arith.constant 3.200000e+01 : f32
    %386 = vector.broadcast %cst_177 : f32 to vector<8x1xf32>
    %387 = arith.divf %385, %386 : vector<8x1xf32>
    %388 = vector.broadcast %380 : vector<8x1xf32> to vector<8x32xf32>
    %389 = arith.subf %372, %388 : vector<8x32xf32>
    %cst_178 = arith.constant 9.99999974E-6 : f32
    %390 = vector.broadcast %cst_178 : f32 to vector<8x1xf32>
    %391 = arith.addf %387, %390 : vector<8x1xf32>
    %392 = math.rsqrt %391 : vector<8x1xf32>
    %393 = vector.broadcast %392 : vector<8x1xf32> to vector<8x32xf32>
    %394 = arith.mulf %389, %393 : vector<8x32xf32>
    %395 = vector.broadcast %374 : vector<1x32xf32> to vector<8x32xf32>
    %396 = arith.mulf %394, %395 : vector<8x32xf32>
    %397 = vector.broadcast %376 : vector<1x32xf32> to vector<8x32xf32>
    %398 = arith.addf %396, %397 : vector<8x32xf32>
    %c0_179 = arith.constant 0 : index
    %c0_180 = arith.constant 0 : index
    %399 = vector.load %arg21[%c0_179, %c0_180] : memref<1x32xf32, #tpu.memory_space<vmem>>, vector<1x32xf32>
    %400 = vector.broadcast %399 : vector<1x32xf32> to vector<8x32xf32>
    %401 = arith.mulf %398, %400 : vector<8x32xf32>
    %cst_181 = arith.constant dense<0.000000e+00> : vector<8xf32>
    %402 = vector.multi_reduction <add>, %401, %cst_181 [1] : vector<8x32xf32> to vector<8xf32>
    %403 = vector.shape_cast %402 : vector<8xf32> to vector<8x1xf32>
    %c0_182 = arith.constant 0 : index
    %c0_183 = arith.constant 0 : index
    %404 = vector.load %arg22[%c0_182, %c0_183] : memref<1x1xf32, #tpu.memory_space<vmem>>, vector<1x1xf32>
    %405 = vector.broadcast %404 : vector<1x1xf32> to vector<8x1xf32>
    %406 = arith.addf %403, %405 : vector<8x1xf32>
    %407 = vector.shape_cast %406 : vector<8x1xf32> to vector<1x8x1xf32>
    %c0_184 = arith.constant 0 : index
    %c0_185 = arith.constant 0 : index
    %c0_186 = arith.constant 0 : index
    %408 = vector.load %arg23[%c0_184, %c0_185, %c0_186] : memref<1x8x1xf32, #tpu.memory_space<vmem>>, vector<1x8x1xf32>
    tpu.vector_store %arg23[%c0_184, %c0_185, %c0_186], %407 {strides = array<i32>} : memref<1x8x1xf32, #tpu.memory_space<vmem>>, vector<1x8x1xf32>,
    return
  }
  func.func @transform_0(%arg0: i32) -> (i32, i32, i32) {
    %c0_i32 = arith.constant 0 : i32
    %c0_i32_0 = arith.constant 0 : i32
    %c0_i32_1 = arith.constant 0 : i32
    return %arg0, %c0_i32, %c0_i32_0 : i32, i32, i32
  }
  func.func @transform_1(%arg0: i32) -> (i32, i32) {
    %c0_i32 = arith.constant 0 : i32
    %c0_i32_0 = arith.constant 0 : i32
    %c0_i32_1 = arith.constant 0 : i32
    return %c0_i32, %c0_i32_0 : i32, i32
  }
  func.func @transform_2(%arg0: i32) -> (i32, i32) {
    %c0_i32 = arith.constant 0 : i32
    %c0_i32_0 = arith.constant 0 : i32
    %c0_i32_1 = arith.constant 0 : i32
    return %c0_i32, %c0_i32_0 : i32, i32
  }
  func.func @transform_3(%arg0: i32) -> (i32, i32) {
    %c0_i32 = arith.constant 0 : i32
    %c0_i32_0 = arith.constant 0 : i32
    %c0_i32_1 = arith.constant 0 : i32
    return %c0_i32, %c0_i32_0 : i32, i32
  }
  func.func @transform_4(%arg0: i32) -> (i32, i32, i32) {
    %c0_i32 = arith.constant 0 : i32
    %c0_i32_0 = arith.constant 0 : i32
    %c0_i32_1 = arith.constant 0 : i32
    %c0_i32_2 = arith.constant 0 : i32
    return %c0_i32, %c0_i32_0, %c0_i32_1 : i32, i32, i32
  }
  func.func @transform_5(%arg0: i32) -> (i32, i32, i32) {
    %c0_i32 = arith.constant 0 : i32
    %c0_i32_0 = arith.constant 0 : i32
    %c0_i32_1 = arith.constant 0 : i32
    %c0_i32_2 = arith.constant 0 : i32
    return %c0_i32, %c0_i32_0, %c0_i32_1 : i32, i32, i32
  }
  func.func @transform_6(%arg0: i32) -> (i32, i32, i32) {
    %c0_i32 = arith.constant 0 : i32
    %c0_i32_0 = arith.constant 0 : i32
    %c0_i32_1 = arith.constant 0 : i32
    %c0_i32_2 = arith.constant 0 : i32
    return %c0_i32, %c0_i32_0, %c0_i32_1 : i32, i32, i32
  }
  func.func @transform_7(%arg0: i32) -> (i32, i32, i32) {
    %c0_i32 = arith.constant 0 : i32
    %c0_i32_0 = arith.constant 0 : i32
    %c0_i32_1 = arith.constant 0 : i32
    %c0_i32_2 = arith.constant 0 : i32
    return %c0_i32, %c0_i32_0, %c0_i32_1 : i32, i32, i32
  }
  func.func @transform_8(%arg0: i32) -> (i32, i32, i32) {
    %c0_i32 = arith.constant 0 : i32
    %c0_i32_0 = arith.constant 0 : i32
    %c0_i32_1 = arith.constant 0 : i32
    %c0_i32_2 = arith.constant 0 : i32
    return %c0_i32, %c0_i32_0, %c0_i32_1 : i32, i32, i32
  }
  func.func @transform_9(%arg0: i32) -> (i32, i32, i32) {
    %c0_i32 = arith.constant 0 : i32
    %c0_i32_0 = arith.constant 0 : i32
    %c0_i32_1 = arith.constant 0 : i32
    %c0_i32_2 = arith.constant 0 : i32
    return %c0_i32, %c0_i32_0, %c0_i32_1 : i32, i32, i32
  }
  func.func @transform_10(%arg0: i32) -> (i32, i32, i32) {
    %c0_i32 = arith.constant 0 : i32
    %c0_i32_0 = arith.constant 0 : i32
    %c0_i32_1 = arith.constant 0 : i32
    %c0_i32_2 = arith.constant 0 : i32
    return %c0_i32, %c0_i32_0, %c0_i32_1 : i32, i32, i32
  }
  func.func @transform_11(%arg0: i32) -> (i32, i32, i32) {
    %c0_i32 = arith.constant 0 : i32
    %c0_i32_0 = arith.constant 0 : i32
    %c0_i32_1 = arith.constant 0 : i32
    %c0_i32_2 = arith.constant 0 : i32
    return %c0_i32, %c0_i32_0, %c0_i32_1 : i32, i32, i32
  }
  func.func @transform_12(%arg0: i32) -> (i32, i32, i32) {
    %c0_i32 = arith.constant 0 : i32
    %c0_i32_0 = arith.constant 0 : i32
    %c0_i32_1 = arith.constant 0 : i32
    %c0_i32_2 = arith.constant 0 : i32
    return %c0_i32, %c0_i32_0, %c0_i32_1 : i32, i32, i32
  }
  func.func @transform_13(%arg0: i32) -> (i32, i32, i32) {
    %c0_i32 = arith.constant 0 : i32
    %c0_i32_0 = arith.constant 0 : i32
    %c0_i32_1 = arith.constant 0 : i32
    %c0_i32_2 = arith.constant 0 : i32
    return %c0_i32, %c0_i32_0, %c0_i32_1 : i32, i32, i32
  }
  func.func @transform_14(%arg0: i32) -> (i32, i32, i32) {
    %c0_i32 = arith.constant 0 : i32
    %c0_i32_0 = arith.constant 0 : i32
    %c0_i32_1 = arith.constant 0 : i32
    %c0_i32_2 = arith.constant 0 : i32
    return %c0_i32, %c0_i32_0, %c0_i32_1 : i32, i32, i32
  }
  func.func @transform_15(%arg0: i32) -> (i32, i32, i32) {
    %c0_i32 = arith.constant 0 : i32
    %c0_i32_0 = arith.constant 0 : i32
    %c0_i32_1 = arith.constant 0 : i32
    %c0_i32_2 = arith.constant 0 : i32
    return %c0_i32, %c0_i32_0, %c0_i32_1 : i32, i32, i32
  }
  func.func @transform_16(%arg0: i32) -> (i32, i32, i32) {
    %c0_i32 = arith.constant 0 : i32
    %c0_i32_0 = arith.constant 0 : i32
    %c0_i32_1 = arith.constant 0 : i32
    %c0_i32_2 = arith.constant 0 : i32
    return %c0_i32, %c0_i32_0, %c0_i32_1 : i32, i32, i32
  }
  func.func @transform_17(%arg0: i32) -> (i32, i32, i32) {
    %c0_i32 = arith.constant 0 : i32
    %c0_i32_0 = arith.constant 0 : i32
    %c0_i32_1 = arith.constant 0 : i32
    %c0_i32_2 = arith.constant 0 : i32
    return %c0_i32, %c0_i32_0, %c0_i32_1 : i32, i32, i32
  }
  func.func @transform_18(%arg0: i32) -> (i32, i32, i32) {
    %c0_i32 = arith.constant 0 : i32
    %c0_i32_0 = arith.constant 0 : i32
    %c0_i32_1 = arith.constant 0 : i32
    %c0_i32_2 = arith.constant 0 : i32
    return %c0_i32, %c0_i32_0, %c0_i32_1 : i32, i32, i32
  }
  func.func @transform_19(%arg0: i32) -> (i32, i32, i32) {
    %c0_i32 = arith.constant 0 : i32
    %c0_i32_0 = arith.constant 0 : i32
    %c0_i32_1 = arith.constant 0 : i32
    %c0_i32_2 = arith.constant 0 : i32
    return %c0_i32, %c0_i32_0, %c0_i32_1 : i32, i32, i32
  }
  func.func @transform_20(%arg0: i32) -> (i32, i32) {
    %c0_i32 = arith.constant 0 : i32
    %c0_i32_0 = arith.constant 0 : i32
    %c0_i32_1 = arith.constant 0 : i32
    return %c0_i32, %c0_i32_0 : i32, i32
  }
  func.func @transform_21(%arg0: i32) -> (i32, i32) {
    %c0_i32 = arith.constant 0 : i32
    %c0_i32_0 = arith.constant 0 : i32
    %c0_i32_1 = arith.constant 0 : i32
    return %c0_i32, %c0_i32_0 : i32, i32
  }
  func.func @transform_22(%arg0: i32) -> (i32, i32, i32) {
    %c0_i32 = arith.constant 0 : i32
    %c0_i32_0 = arith.constant 0 : i32
    %c0_i32_1 = arith.constant 0 : i32
    return %arg0, %c0_i32, %c0_i32_0 : i32, i32, i32
  }
}

</mosaic_0001>

<bundles_post_ra>
// kernel: stock_transformer_forward.1
= control target key start
LH: loop header
LB: loop body
LE: loop exit
PB: predicated region body
PF: predicated region fallthrough
CT: control target
= control target key end

     0   :  { %s3590_s29 = smov 0   ;;  %s4057_s0 = inlined_call_operand.vmem [shape: f32[2,8,4], index: 0, kind: input, shape index: {}]   ;;  %s4058_s1 = inlined_call_operand.vmem [shape: f32[8,32], index: 1, kind: input, shape index: {}]   ;;  %s4059_s2 = inlined_call_operand.vmem [shape: bf16[4,32], index: 2, kind: input, shape index: {}]   ;;  %s4060_s3 = inlined_call_operand.vmem [shape: f32[1,32], index: 3, kind: input, shape index: {}]   ;;  %s4061_s4 = inlined_call_operand.vmem [shape: bf16[2,32,32], index: 4, kind: input, shape index: {}]   ;;  %s4062_s5 = inlined_call_operand.vmem [shape: f32[2,1,32], index: 5, kind: input, shape index: {}]   ;;  %s4063_s6 = inlined_call_operand.vmem [shape: bf16[2,32,32], index: 6, kind: input, shape index: {}]   ;;  %s4064_s7 = inlined_call_operand.vmem [shape: f32[2,1,32], index: 7, kind: input, shape index: {}]   ;;  %s4065_s8 = inlined_call_operand.vmem [shape: bf16[2,32,32], index: 8, kind: input, shape index: {}]   ;;  %s4066_s9 = inlined_call_operand.vmem [shape: f32[2,1,32], index: 9, kind: input, shape index: {}]   ;;  %s4067_s10 = inlined_call_operand.vmem [shape: bf16[2,32,32], index: 10, kind: input, shape index: {}]   ;;  %s4068_s11 = inlined_call_operand.vmem [shape: f32[2,1,32], index: 11, kind: input, shape index: {}]   ;;  %s4069_s12 = inlined_call_operand.vmem [shape: f32[2,1,32], index: 12, kind: input, shape index: {}]   ;;  %s4070_s13 = inlined_call_operand.vmem [shape: f32[2,1,32], index: 13, kind: input, shape index: {}]   ;;  %s4071_s14 = inlined_call_operand.vmem [shape: bf16[2,32,64], index: 14, kind: input, shape index: {}]   ;;  %s4072_s15 = inlined_call_operand.vmem [shape: f32[2,1,64], index: 15, kind: input, shape index: {}]   ;;  %s4073_s16 = inlined_call_operand.vmem [shape: bf16[2,64,32], index: 16, kind: input, shape index: {}]   ;;  %s4074_s17 = inlined_call_operand.vmem [shape: f32[2,1,32], index: 17, kind: input, shape index: {}]   ;;  %s4075_s18 = inlined_call_operand.vmem [shape: f32[2,1,32], index: 18, kind: input, shape index: {}]   ;;  %s4076_s19 = inlined_call_operand.vmem [shape: f32[2,1,32], index: 19, kind: input, shape index: {}]   ;;  %s4077_s20 = inlined_call_operand.vmem [shape: f32[1,32], index: 20, kind: input, shape index: {}]   ;;  %s4078_s21 = inlined_call_operand.<no memory space> [shape: f32[1,1], index: 21, kind: input, shape index: {}]   ;;  %s4079_s22 = inlined_call_operand.vmem [shape: f32[2,8,1], index: 22, kind: output, shape index: {}]  }
   0x1   :  { %4084 = sst [smem:[#allocation3_spill]] %s4057_s0  ;;  %v27_v0 = vstv %s4078_s21 }
   0x2   :  { %4085 = sst [smem:[#allocation4_spill]] %s4058_s1  ;;  %28 = vst [vmem:[#allocation2] sm:$0x1] %v27_v0 }
   0x3   :  { %4086 = sst [smem:[#allocation5_spill]] %s4059_s2 }
   0x4   :  { %4087 = sst [smem:[#allocation6_spill]] %s4060_s3 }
   0x5   :  { %4088 = sst [smem:[#allocation7_spill]] %s4061_s4 }
   0x6   :  { %4089 = sst [smem:[#allocation8_spill]] %s4062_s5 }
   0x7   :  { %4090 = sst [smem:[#allocation9_spill]] %s4063_s6 }
   0x8 LB: > { %s2931_s30 = sadd.s32 4294967295, %s3465_s29   ;;  %p2935_p0 = scmp.ge.s32.totalorder %s3465_s29, 1  ;;  %s3465_s29 = sphi %s3590_s29, %s34_s29  }
   0x9   : > { %p613_p1 = scmp.lt.s32.totalorder %s3465_s29, 3 }
   0xb   : > { %p614_p2 = pnand %p2935_p0, %p613_p1 }
   0xc   : > { %s4091_s23 = sld [smem:[#allocation5_spill]] (!%p614_p2)  ;;  %p673_p3 = scmp.lt.s32.totalorder (!%p614_p2), %s2931_s30, 1 }
   0xd   : > { %617 = sbr.rel (%p614_p2) target bundleno = 7305 (0x1c89), region = 108  ;;  %s4092_s24 = sld [smem:[#allocation3_spill]] (!%p614_p2) }
   0xe   : > { %s4093_s2 = sld [smem:[#allocation7_spill]] (!%p614_p2)  ;;  %s3469_s27 = smov (!%p614_p2), 120  }
   0xf   : > { %s4095_s26 = sld [smem:[#allocation4_spill]] (!%p614_p2)  ;;  %s3470_s3 = smov (!%p614_p2), 112  }
  0x10   : > { %s4096_s28 = sld [smem:[#allocation9_spill]] (!%p614_p2)  ;;  %s3471_s5 = smov (!%p614_p2), 104  }
  0x12   : > { %v684_v1 = vld [vmem:[%s4091_s23] sm:$0x3]  ;;  %vm696_vm0 = vcmask 1041408   ;;  %v3467_v2 = vmov 0.0   ;;  %vm3468_vm1 = vmmov 0   ;;  %s4100_s30 = smov (!%p673_p3, %s2931_s30), 1 }
  0x13   : > { %3144 = vmatprep.subr.bf16.mxu0 %v3467_v2  ;;  %v698_v3 = vsel %vm696_vm0, %v684_v1, 0  ;;  %3146 = vmatprep.mubr.msk.bf16.mxu0 %vm3468_vm1, %v3467_v2  ;;  %s4083_s21 = sshll.u32 %s4100_s30, 3  ;;  %vm692_vm2 = vcmask 31744   ;;  %v3396_v7 = vld [vmem:[%s4065_s8 + $0x8] sm:$0xff]   ;;  %v3398_v9 = vld [vmem:[%s4065_s8] sm:$0xff]   ;;  %vm766_vm3 = vcmask 261120  }
  0x14   : > { %3145 = vmatpush3.bf16.msra.mxu0 %v698_v3  ;;  %3166 = vmatprep.subr.bf16.mxu1 %v3467_v2  ;;  %s676_s6 = scalar_lea.vmem %s4092_s24, %s4083_s21  ;;  %v3395_v6 = vld [vmem:[%s4093_s2 + $0x8] sm:$0xff]   ;;  %v3397_v8 = vld [vmem:[%s4093_s2] sm:$0xff]   ;;  %s4094_s24 = sld [smem:[#allocation6_spill]]  ;;  %vm1006_vm4 = vcmask 1043456   ;;  %vm944_vm5 = vcmask 64512   ;;  %vm1720_vm6 = vcmask 523264  }
  0x15   : > { %3150 = vmatprep.subr.bf16.mxu0 %v3467_v2  ;;  %3170 = vmatprep.mubr.msk.bf16.mxu1 %vm3468_vm1, %v3467_v2  ;;  %v682_v4 = vld [vmem:[%s676_s6] sm:$0xff]  ;;  %s4097_s6 = sld [smem:[#allocation8_spill]]  ;;  %s4098_s21 = sshll.u32 %s4100_s30, 3  ;;  %vm2876_vm7 = vcmask 7168  }
  0x16   : > { %v683_v5 = vpack.c.bf16 %v682_v4, %v682_v4  ;;  %3167 = vmatpush3.bf16.msra.mxu1 %v3396_v7  ;;  %v740_v12 = vld [vmem:[%s4095_s26] sm:$0xff]  ;;  %v3399_v17 = vld [vmem:[%s4096_s28 + $0x8] sm:$0xff]   ;;  %s680_s0 = scalar_lea.vmem %s4079_s22, %s4098_s21 }
  0x17   : > { %3168 = vmatprep.subr.bf16.mxu1 %v3467_v2  ;;  %v3400_v20 = vld [vmem:[%s4096_s28] sm:$0xff]  }
  0x18   : > { %3147 = vmatmul.mubr.msk.bf16.vlgmr.msra.gmra.mxu0 %vm692_vm2, %v683_v5  ;;  %v2948_v21 = vld [vmem:[%s4066_s9] ss:$0 sm:$0xff] }
  0x19   : > { %3154 = vmatprep.mubr.msk.bf16.mxu0 %vm3468_vm1, %v3467_v2  ;;  %3151 = vmatpush3.bf16.msra.mxu0 %v3395_v6  ;;  %v2944_v34 = vld [vmem:[%s4064_s7] ss:$0 sm:$0xff] }
  0x1a   : > { %3152 = vmatprep.subr.bf16.mxu0 %v3467_v2  ;;  %3169 = vmatpush3.bf16.msra.mxu1 %v3398_v9  ;;  %v2938_v10 = vld [vmem:[%s4094_s24] ss:$0 sm:$0xff]  ;;  %v941_v9 = vld [vmem:[%s4067_s10 + $0x4] sm:$0xf] }
  0x1b   : > { %3180 = vmatprep.subr.bf16.mxu1 %v3467_v2  ;;  %v2940_v28 = vld [vmem:[%s4097_s6] ss:$0 sm:$0xff] }
  0x1d   : > { %3153 = vmatpush3.bf16.msra.mxu0 %v3397_v8 }
  0x1e   : > { %3158 = vmatprep.subr.bf16.mxu0 %v3467_v2 }
  0xd8   : > { %v734_v11 = vpop.f32.mrf.mxu0 }
  0xd9   : > { %v735_v13 = vadd.f32 %v2938_v10, %v734_v11  ;;  %v1169_v10 = vsel %vm1006_vm4, %v941_v9, 0 }
  0xda   : > { %v3148_v14 = vpop.f32.mrf.mxu0 }
  0xdb   : > { %v3640_v15 = vadd.f32 %v740_v12, %v735_v13 }
  0xdc   : > { %v737_v16 = vpop.f32.mrf.mxu0 }
  0xdd   : > { %v742_v18 = vpack.c.bf16 %v3640_v15, %v3640_v15  ;;  %v940_v16 = vld [vmem:[%s4067_s10] sm:$0xf] }
  0xde   : > { %v3149_v19 = vpop.f32.mrf.mxu0 }
  0xdf   : > { %3155 = vmatmul.mubr.msk.bf16.vlgmr.msra.gmra.mxu0 %vm766_vm3, %v742_v18  ;;  %3171 = vmatmul.mubr.msk.bf16.vlgmr.msra.gmra.mxu1 %vm766_vm3, %v742_v18  ;;  %v1215_v19 = vsel %vm1006_vm4, %v940_v16, 0 }
  0xe0   : > { %3159 = vmatpush3.bf16.msra.mxu0 %v3399_v17  ;;  %3162 = vmatprep.mubr.msk.bf16.mxu0 %vm3468_vm1, %v3467_v2 }
  0xe1   : > { %3160 = vmatprep.subr.bf16.mxu0 %v3467_v2  ;;  %3182 = vmatprep.mubr.msk.bf16.mxu1 %vm3468_vm1, %v3467_v2 }
  0xe4   : > { %3161 = vmatpush3.bf16.msra.mxu0 %v3400_v20 }
  0xe5   : > { %3174 = vmatprep.subr.bf16.mxu0 %v3467_v2 }
  0xe7   : > { %3163 = vmatmul.mubr.msk.bf16.vlgmr.msra.gmra.mxu0 %vm766_vm3, %v742_v18 }
  0xe8   : > { %3176 = vmatprep.mubr.msk.bf16.mxu0 %vm3468_vm1, %v3467_v2 }
 0x19f   : > { %v804_v22 = vpop.f32.mrf.mxu0  ;;  %v930_v23 = vpop.f32.mrf.mxu1 }
 0x1a0   : > { %v931_v24 = vadd.f32 %v2948_v21, %v930_v23  ;;  %v805_v35 = vadd.f32 %v2940_v28, %v804_v22 }
 0x1a1   : > { %v3156_v25 = vpop.f32.mrf.mxu0  ;;  %v3172_v26 = vpop.f32.mrf.mxu1 }
 0x1a2   : > { %v3664_v27 = vpack.c.bf16 %v931_v24, %v931_v24  ;;  %v936_v39 = vmul.f32 0.35355338, %v805_v35 }
 0x1a3   : > { %v807_v29 = vpop.f32.mrf.mxu0  ;;  %v933_v30 = vpop.f32.mrf.mxu1 }
 0x1a4   : > { %v1008_v31 = vsel %vm1006_vm4, %v3664_v27, 0  ;;  %v3681_v44 = vpack.c.bf16 %v936_v39, %v936_v39 }
 0x1a5   : > { %v3157_v32 = vpop.f32.mrf.mxu0  ;;  %v3173_v33 = vpop.f32.mrf.mxu1  ;;  %3181 = vmatpush3.bf16.msra.mxu1 %v1008_v31 }
 0x1a6   : > { %3192 = vmatprep.subr.bf16.mxu1 %v3467_v2 }
 0x1a7   : > { %v867_v36 = vpop.f32.mrf.mxu0 }
 0x1a8   : > { %v868_v37 = vadd.f32 %v2944_v34, %v867_v36 }
 0x1a9   : > { %v3164_v38 = vpop.f32.mrf.mxu0 }
 0x1aa   : > { %v3675_v40 = vpack.c.bf16 %v868_v37, %v868_v37 }
 0x1ab   : > { %v870_v41 = vpop.f32.mrf.mxu0 }
 0x1ac   : > { %1055 = vrot.lane.b32.xlu0 %v3675_v40, %s3469_s27  ;;  %v949_v42 = vsel %vm944_vm5, %v3675_v40, 0 }
 0x1ad   : > { %v3165_v43 = vpop.f32.mrf.mxu0  ;;  %3175 = vmatpush3.bf16.xpose.msra.mxu0 %v949_v42 }
 0x1ae   : > { %3186 = vmatprep.subr.bf16.mxu0 %v3467_v2 }
 0x1b0   : > { %1052 = vrot.lane.b32.xlu0 %v3681_v44, %s3469_s27 }
 0x1b4   : > { %3177 = vmatmul.mubr.msk.bf16.vlgmr.msra.gmra.mxu0 %vm944_vm5, %v3681_v44 }
 0x1b5   : > { %3188 = vmatprep.mubr.msk.bf16.mxu0 %vm3468_vm1, %v3467_v2 }
 0x21e   : > { %v1056_v45 = vpop.permute.xlu0 %1055 }
 0x21f   : > { %v1061_v46 = vsel %vm944_vm5, %v1056_v45, 0 }
 0x220   : > { %3187 = vmatpush3.bf16.xpose.msra.mxu0 %v1061_v46 }
 0x221   : > { %3198 = vmatprep.subr.bf16.mxu0 %v3467_v2 }
 0x222   : > { %v1053_v47 = vpop.permute.xlu0 %1052 }
 0x227   : > { %3189 = vmatmul.mubr.msk.bf16.vlgmr.msra.gmra.mxu0 %vm944_vm5, %v1053_v47 }
 0x228   : > { %3200 = vmatprep.mubr.msk.bf16.mxu0 %vm3468_vm1, %v3467_v2  ;;  %3199 = vmatpush3.bf16.msra.mxu0 %v1169_v10 }
 0x229   : > { %3210 = vmatprep.subr.bf16.mxu0 %v3467_v2 }
 0x274   : > { %v985_v48 = vpop.f32.mrf.mxu0 }
 0x275   : > { %v991_v49 = vsel %vm944_vm5, %v985_v48, -inf }
 0x276   : > { %992 = vmax.xlane.f32.xlu1 %v991_v49  ;;  %v3178_v50 = vpop.f32.mrf.mxu0 }
 0x278   : > { %v988_v51 = vpop.f32.mrf.mxu0 }
 0x27a   : > { %v3179_v52 = vpop.f32.mrf.mxu0 }
 0x2e7   : > { %v1097_v53 = vpop.f32.mrf.mxu0 }
 0x2e8   : > { %v1103_v54 = vsel %vm944_vm5, %v1097_v53, -inf }
 0x2e9   : > { %1104 = vmax.xlane.f32.xlu1 %v1103_v54  ;;  %v3190_v55 = vpop.f32.mrf.mxu0 }
 0x2eb   : > { %v1100_v56 = vpop.f32.mrf.mxu0 }
 0x2ed   : > { %v3191_v57 = vpop.f32.mrf.mxu0 }
 0x2ff   : > { %v993_v58 = vpop.xlane.xlu1 %992 }
 0x300   : > { %v994_v59 = vsub.f32 %v985_v48, %v993_v58 }
 0x302   : > { %v995_v60 = vmul.f32 1.442695, %v994_v59 }
 0x304   : > { %3419 = vpow2.f32 %v995_v60 }
 0x311   : > { %v3420_v61 = vpop.eup %3419 }
 0x312   : > { %v997_v62 = vsel %vm944_vm5, %v3420_v61, 0.0 }
 0x313   : > { %998 = vadd.xlane.f32.xlu0 %v997_v62 }
 0x329   : > { %1319 = vrot.lane.b32.xlu0 %v3664_v27, %s3470_s3 }
 0x372   : > { %v1105_v63 = vpop.xlane.xlu1 %1104 }
 0x373   : > { %v1106_v0 = vsub.f32 %v1097_v53, %v1105_v63 }
 0x375   : > { %v1107_v1 = vmul.f32 1.442695, %v1106_v0 }
 0x377   : > { %3421 = vpow2.f32 %v1107_v1 }
 0x384   : > { %v3422_v3 = vpop.eup %3421 }
 0x385   : > { %v1109_v4 = vsel %vm944_vm5, %v3422_v3, 0.0 }
 0x386   : > { %1110 = vadd.xlane.f32.xlu1 %v1109_v4 }
 0x397   : > { %1116 = vrot.lane.b32.xlu1 %v3664_v27, %s3469_s27 }
 0x39b   : > { %1259 = vrot.lane.b32.xlu1 %v3675_v40, %s3470_s3 }
 0x39c   : > { %v999_v5 = vpop.xlane.xlu0 %998 }
 0x39d   : > { %3423 = vrcp.f32 %v999_v5 }
 0x39f   : > { %1257 = vrot.lane.b32.xlu1 %v3681_v44, %s3470_s3 }
 0x3a0   : > { %v1320_v20 = vpop.permute.xlu0 %1319 }
 0x3a1   : > { %v1325_v24 = vsel %vm1006_vm4, %v1320_v20, 0 }
 0x3aa   : > { %v3424_v6 = vpop.eup %3423 }
 0x3ab   : > { %v1001_v7 = vmul.f32 %v3424_v6, %v3420_v61 }
 0x3ad   : > { %v1002_v8 = vpack.c.bf16 %v1001_v7, %v1001_v7 }
 0x3af   : > { %3183 = vmatmul.mubr.msk.bf16.vlgmr.msra.gmra.mxu1 %vm944_vm5, %v1002_v8 }
 0x3b0   : > { %3194 = vmatprep.mubr.msk.bf16.mxu1 %vm3468_vm1, %v3467_v2 }
 0x40f   : > { %v1111_v11 = vpop.xlane.xlu1 %1110 }
 0x410   : > { %3425 = vrcp.f32 %v1111_v11 }
 0x413   : > { %v1117_v12 = vpop.permute.xlu1 %1116 }
 0x414   : > { %v1122_v13 = vsel %vm1006_vm4, %v1117_v12, 0 }
 0x415   : > { %3193 = vmatpush3.bf16.msra.mxu1 %v1122_v13 }
 0x416   : > { %3204 = vmatprep.subr.bf16.mxu1 %v3467_v2 }
 0x417   : > { %v1260_v28 = vpop.permute.xlu1 %1259 }
 0x418   : > { %v1265_v32 = vsel %vm944_vm5, %v1260_v28, 0 }
 0x41b   : > { %v1258_v35 = vpop.permute.xlu1 %1257 }
 0x41d   : > { %v3426_v14 = vpop.eup %3425 }
 0x41e   : > { %v1113_v17 = vmul.f32 %v3426_v14, %v3422_v3 }
 0x420   : > { %v1114_v18 = vpack.c.bf16 %v1113_v17, %v1113_v17 }
 0x422   : > { %3195 = vmatmul.mubr.msk.bf16.vlgmr.msra.gmra.mxu1 %vm944_vm5, %v1114_v18  ;;  %v943_v18 = vld [vmem:[%s4067_s10 + $0xc] sm:$0xf] }
 0x423   : > { %3205 = vmatpush3.bf16.msra.mxu1 %v1215_v19  ;;  %3206 = vmatprep.mubr.msk.bf16.mxu1 %vm3468_vm1, %v3467_v2  ;;  %v1530_v20 = vsel %vm1006_vm4, %v943_v18, 0 }
 0x424   : > { %3216 = vmatprep.subr.bf16.mxu1 %v3467_v2 }
 0x46f   : > { %v1044_v21 = vpop.f32.mrf.mxu1 }
 0x470   : > { %v1050_v22 = vpack.c.bf16 %v1044_v21, %v1044_v21 }
 0x471   : > { %v3184_v23 = vpop.f32.mrf.mxu1 }
 0x472   : > { %3207 = vmatmul.mubr.msk.bf16.vlgmr.msra.gmra.mxu1 %vm944_vm5, %v1050_v22 }
 0x473   : > { %3217 = vmatpush3.bf16.msra.mxu1 %v1325_v24  ;;  %v1047_v25 = vpop.f32.mrf.mxu1  ;;  %3218 = vmatprep.mubr.msk.bf16.mxu1 %vm3468_vm1, %v3467_v2 }
 0x474   : > { %3228 = vmatprep.subr.bf16.mxu1 %v3467_v2 }
 0x475   : > { %v3185_v26 = vpop.f32.mrf.mxu1 }
 0x4e2   : > { %v1158_v29 = vpop.f32.mrf.mxu1 }
 0x4e3   : > { %v1164_v30 = vpack.c.bf16 %v1158_v29, %v1158_v29 }
 0x4e4   : > { %v3196_v31 = vpop.f32.mrf.mxu1 }
 0x4e5   : > { %3201 = vmatmul.mubr.msk.bf16.vlgmr.msra.gmra.mxu0 %vm944_vm5, %v1164_v30 }
 0x4e6   : > { %3211 = vmatpush3.bf16.xpose.msra.mxu0 %v1265_v32  ;;  %v1161_v33 = vpop.f32.mrf.mxu1  ;;  %3212 = vmatprep.mubr.msk.bf16.mxu0 %vm3468_vm1, %v3467_v2 }
 0x4e7   : > { %3222 = vmatprep.subr.bf16.mxu0 %v3467_v2 }
 0x4e8   : > { %v3197_v34 = vpop.f32.mrf.mxu1 }
 0x4ed   : > { %3213 = vmatmul.mubr.msk.bf16.vlgmr.msra.gmra.mxu0 %vm944_vm5, %v1258_v35 }
 0x4ee   : > { %3224 = vmatprep.mubr.msk.bf16.mxu0 %vm3468_vm1, %v3467_v2 }
 0x532   : > { %v3738_v36 = vpop.f32.mrf.mxu1 }
 0x534   : > { %v3208_v37 = vpop.f32.mrf.mxu1 }
 0x536   : > { %v1254_v38 = vpop.f32.mrf.mxu1 }
 0x537   : > { %v2964_v38 = vld [vmem:[%s4068_s11] ss:$0 sm:$0xff] }
 0x538   : > { %v3209_v39 = vpop.f32.mrf.mxu1 }
 0x5a5   : > { %v1205_v41 = vpop.f32.mrf.mxu0 }
 0x5a6   : > { %v1252_v16 = vadd.f32 %v3738_v36, %v1205_v41 }
 0x5a7   : > { %v3202_v42 = vpop.f32.mrf.mxu0 }
 0x5a9   : > { %v1208_v43 = vpop.f32.mrf.mxu0 }
 0x5ab   : > { %v3203_v45 = vpop.f32.mrf.mxu0 }
 0x5ad   : > { %v1301_v46 = vpop.f32.mrf.mxu0 }
 0x5ae   : > { %v1307_v47 = vsel %vm944_vm5, %v1301_v46, -inf }
 0x5af   : > { %1308 = vmax.xlane.f32.xlu1 %v1307_v47  ;;  %v3214_v48 = vpop.f32.mrf.mxu0 }
 0x5b1   : > { %v1304_v49 = vpop.f32.mrf.mxu0 }
 0x5b3   : > { %v3215_v50 = vpop.f32.mrf.mxu0 }
 0x638   : > { %v1309_v51 = vpop.xlane.xlu1 %1308 }
 0x639   : > { %v1310_v52 = vsub.f32 %v1301_v46, %v1309_v51  ;;  %v3401_v51 = vld [vmem:[%s4071_s14 + $0x8] sm:$0xff]  }
 0x63b   : > { %v1311_v53 = vmul.f32 1.442695, %v1310_v52  ;;  %v3403_v52 = vld [vmem:[%s4073_s16 + $0x18] sm:$0xff]  }
 0x63d   : > { %3427 = vpow2.f32 %v1311_v53  ;;  %v3404_v53 = vld [vmem:[%s4073_s16 + $0x10] sm:$0xff]  }
 0x64a   : > { %v3428_v54 = vpop.eup %3427 }
 0x64b   : > { %v1313_v55 = vsel %vm944_vm5, %v3428_v54, 0.0 }
 0x64c   : > { %1314 = vadd.xlane.f32.xlu0 %v1313_v55 }
 0x662   : > { %1417 = vrot.lane.b32.xlu0 %v3675_v40, %s3471_s5 }
 0x666   : > { %1415 = vrot.lane.b32.xlu0 %v3681_v44, %s3471_s5  ;;  %v942_v44 = vld [vmem:[%s4067_s10 + $0x8] sm:$0xf] }
 0x667   : > { %v1372_v62 = vsel %vm1006_vm4, %v942_v44, 0 }
 0x668   : > { %3223 = vmatpush3.bf16.msra.mxu0 %v1372_v62  ;;  %v3405_v62 = vld [vmem:[%s4073_s16 + $0x8] sm:$0xff]  }
 0x669   : > { %3234 = vmatprep.subr.bf16.mxu0 %v3467_v2 }
 0x6d5   : > { %v1315_v56 = vpop.xlane.xlu0 %1314 }
 0x6d6   : > { %3429 = vrcp.f32 %v1315_v56 }
 0x6d9   : > { %v1418_v59 = vpop.permute.xlu0 %1417 }
 0x6da   : > { %v1423_v61 = vsel %vm944_vm5, %v1418_v59, 0 }
 0x6dd   : > { %v1416_v40 = vpop.permute.xlu0 %1415 }
 0x6e3   : > { %v3430_v57 = vpop.eup %3429 }
 0x6e4   : > { %v1317_v58 = vmul.f32 %v3430_v57, %v3428_v54 }
 0x6e6   : > { %v1318_v60 = vpack.c.bf16 %v1317_v58, %v1317_v58  ;;  %v2965_v58 = vld [vmem:[%s4069_s12] ss:$0 sm:$0xff] }
 0x6e8   : > { %3219 = vmatmul.mubr.msk.bf16.vlgmr.msra.gmra.mxu1 %vm944_vm5, %v1318_v60  ;;  %v2966_v60 = vld [vmem:[%s4070_s13] ss:$0 sm:$0xff] }
 0x6e9   : > { %3229 = vmatpush3.bf16.xpose.msra.mxu1 %v1423_v61  ;;  %3230 = vmatprep.mubr.msk.bf16.mxu1 %vm3468_vm1, %v3467_v2 }
 0x6ea   : > { %3240 = vmatprep.subr.bf16.mxu1 %v3467_v2 }
 0x6f0   : > { %3231 = vmatmul.mubr.msk.bf16.vlgmr.msra.gmra.mxu1 %vm944_vm5, %v1416_v40 }
 0x6f1   : > { %3242 = vmatprep.mubr.msk.bf16.mxu1 %vm3468_vm1, %v3467_v2  ;;  %3241 = vmatpush3.bf16.msra.mxu1 %v1530_v20 }
 0x6f2   : > { %3254 = vmatprep.subr.bf16.mxu1 %v3467_v2 }
 0x7a8   : > { %v1361_v63 = vpop.f32.mrf.mxu1 }
 0x7a9   : > { %v1367_v0 = vpack.c.bf16 %v1361_v63, %v1361_v63  ;;  %v3406_v63 = vld [vmem:[%s4073_s16] sm:$0xff]  }
 0x7aa   : > { %v3220_v1 = vpop.f32.mrf.mxu1 }
 0x7ab   : > { %3225 = vmatmul.mubr.msk.bf16.vlgmr.msra.gmra.mxu0 %vm944_vm5, %v1367_v0  ;;  %v2967_v0 = vld [vmem:[%s4072_s15] ss:$0 sm:$0xff] }
 0x7ac   : > { %v1364_v3 = vpop.f32.mrf.mxu1  ;;  %3236 = vmatprep.mubr.msk.bf16.mxu0 %vm3468_vm1, %v3467_v2 }
 0x7ae   : > { %v3221_v4 = vpop.f32.mrf.mxu1 }
 0x7b0   : > { %v1459_v5 = vpop.f32.mrf.mxu1 }
 0x7b1   : > { %v1465_v6 = vsel %vm944_vm5, %v1459_v5, -inf }
 0x7b2   : > { %1466 = vmax.xlane.f32.xlu0 %v1465_v6  ;;  %v3232_v7 = vpop.f32.mrf.mxu1 }
 0x7b4   : > { %v1462_v8 = vpop.f32.mrf.mxu1 }
 0x7b6   : > { %v3233_v9 = vpop.f32.mrf.mxu1 }
 0x7b7   : > { %v2971_v9 = vld [vmem:[%s4074_s17] ss:$0 sm:$0xff] }
 0x83b   : > { %v1467_v10 = vpop.xlane.xlu0 %1466 }
 0x83c   : > { %v1468_v11 = vsub.f32 %v1459_v5, %v1467_v10 }
 0x83e   : > { %v1469_v12 = vmul.f32 1.442695, %v1468_v11 }
 0x840   : > { %3431 = vpow2.f32 %v1469_v12 }
 0x84d   : > { %v3432_v13 = vpop.eup %3431 }
 0x84e   : > { %v1471_v14 = vsel %vm944_vm5, %v3432_v13, 0.0 }
 0x84f   : > { %1472 = vadd.xlane.f32.xlu1 %v1471_v14 }
 0x860   : > { %1477 = vrot.lane.b32.xlu1 %v3664_v27, %s3471_s5 }
 0x86b   : > { %v1408_v17 = vpop.f32.mrf.mxu0 }
 0x86c   : > { %v1414_v19 = vadd.f32 %v1408_v17, %v1252_v16 }
 0x86d   : > { %v3226_v21 = vpop.f32.mrf.mxu0 }
 0x86f   : > { %v1411_v22 = vpop.f32.mrf.mxu0 }
 0x871   : > { %v3227_v23 = vpop.f32.mrf.mxu0 }
 0x872   : > { %v3407_v23 = vld [vmem:[%s4093_s2 + $0x18] sm:$0xff]  }
 0x8d8   : > { %v1473_v24 = vpop.xlane.xlu1 %1472 }
 0x8d9   : > { %3433 = vrcp.f32 %v1473_v24  ;;  %v3408_v24 = vld [vmem:[%s4065_s8 + $0x18] sm:$0xff]  }
 0x8dc   : > { %v1478_v25 = vpop.permute.xlu1 %1477 }
 0x8dd   : > { %v1483_v27 = vsel %vm1006_vm4, %v1478_v25, 0  ;;  %v3409_v25 = vld [vmem:[%s4093_s2 + $0x10] sm:$0xff]  }
 0x8de   : > { %3235 = vmatpush3.bf16.msra.mxu0 %v1483_v27  ;;  %v3410_v27 = vld [vmem:[%s4065_s8 + $0x10] sm:$0xff]  }
 0x8df   : > { %3246 = vmatprep.subr.bf16.mxu0 %v3467_v2 }
 0x8e6   : > { %v3434_v26 = vpop.eup %3433 }
 0x8e7   : > { %v1475_v28 = vmul.f32 %v3434_v26, %v3432_v13 }
 0x8e9   : > { %v1476_v29 = vpack.c.bf16 %v1475_v28, %v1475_v28 }
 0x8eb   : > { %3237 = vmatmul.mubr.msk.bf16.vlgmr.msra.gmra.mxu0 %vm944_vm5, %v1476_v29 }
 0x8ec   : > { %3250 = vmatprep.mubr.msk.bf16.mxu0 %vm3468_vm1, %v3467_v2  ;;  %3247 = vmatpush3.bf16.msra.mxu0 %v3401_v51 }
 0x8ed   : > { %3248 = vmatprep.subr.bf16.mxu0 %v3467_v2 }
 0x9ab   : > { %v1519_v30 = vpop.f32.mrf.mxu0 }
 0x9ac   : > { %v1525_v31 = vpack.c.bf16 %v1519_v30, %v1519_v30 }
 0x9ad   : > { %v3238_v32 = vpop.f32.mrf.mxu0 }
 0x9ae   : > { %3243 = vmatmul.mubr.msk.bf16.vlgmr.msra.gmra.mxu1 %vm944_vm5, %v1525_v31  ;;  %v2977_v31 = vld [vmem:[%s4075_s18] ss:$0 sm:$0xff] }
 0x9af   : > { %v1522_v33 = vpop.f32.mrf.mxu0  ;;  %3262 = vmatprep.mubr.msk.bf16.mxu1 %vm3468_vm1, %v3467_v2  ;;  %3255 = vmatpush3.bf16.msra.mxu1 %v3403_v52 }
 0x9b0   : > { %3256 = vmatprep.subr.bf16.mxu1 %v3467_v2  ;;  %v2978_v33 = vld [vmem:[%s4076_s19] ss:$0 sm:$0xff] }
 0x9b1   : > { %v3239_v34 = vpop.f32.mrf.mxu0 }
 0x9b3   : > { %3257 = vmatpush3.bf16.msra.mxu1 %v3404_v53 }
 0x9b4   : > { %3258 = vmatprep.subr.bf16.mxu1 %v3467_v2 }
 0x9b7   : > { %3259 = vmatpush3.bf16.msra.mxu1 %v3405_v62 }
 0x9b8   : > { %3260 = vmatprep.subr.bf16.mxu1 %v3467_v2 }
 0x9bb   : > { %3261 = vmatpush3.bf16.msra.mxu1 %v3406_v63 }
 0x9bc   : > { %3282 = vmatprep.subr.bf16.mxu1 %v3467_v2 }
 0xa6e   : > { %v1566_v35 = vpop.f32.mrf.mxu1 }
 0xa6f   : > { %v1572_v36 = vadd.f32 %v1566_v35, %v1414_v19 }
 0xa70   : > { %v3244_v37 = vpop.f32.mrf.mxu1 }
 0xa71   : > { %v1573_v39 = vadd.f32 %v1572_v36, %v3640_v15  ;;  %v3402_v15 = vld [vmem:[%s4071_s14] sm:$0xff]   ;;  %v3411_v36 = vld [vmem:[%s4096_s28 + $0x18] sm:$0xff]  }
 0xa72   : > { %v1569_v41 = vpop.f32.mrf.mxu1  ;;  %3249 = vmatpush3.bf16.msra.mxu0 %v3402_v15 }
 0xa73   : > { %v1581_v42 = vadd.f32 %v2964_v38, %v1573_v39  ;;  %3266 = vmatprep.subr.bf16.mxu0 %v3467_v2  ;;  %v3412_v38 = vld [vmem:[%s4096_s28 + $0x10] sm:$0xff]   ;;  %v2984_v39 = vld [vmem:[%s4097_s6 + $0x1] ss:$0 sm:$0xff] }
 0xa74   : > { %v3245_v43 = vpop.f32.mrf.mxu1  ;;  %v3002_v41 = vld [vmem:[%s4066_s9 + $0x1] ss:$0 sm:$0xff] }
 0xa75   : > { %v1584_v45 = vsel %vm766_vm3, %v1581_v42, 0.0 }
 0xa76   : > { %1585 = vadd.xlane.f32.xlu1 %v1584_v45 }
 0xaff   : > { %v1586_v46 = vpop.xlane.xlu1 %1585 }
 0xb00   : > { %v1588_v47 = vmul.f32 0.03125, %v1586_v46 }
 0xb02   : > { %v1589_v48 = vsub.f32 %v1581_v42, %v1588_v47 }
 0xb04   : > { %v1590_v49 = vmul.f32 %v1589_v48, %v1589_v48 }
 0xb06   : > { %v1591_v50 = vsel %vm766_vm3, %v1590_v49, 0.0 }
 0xb07   : > { %1592 = vadd.xlane.f32.xlu0 %v1591_v50 }
 0xb90   : > { %v1593_v54 = vpop.xlane.xlu0 %1592 }
 0xb91   : > { %v1594_v55 = vmul.f32 0.03125, %v1593_v54 }
 0xb93   : > { %v1595_v56 = vadd.f32 1e-05, %v1594_v55 }
 0xb95   : > { %3435 = vrsqrt.f32 %v1595_v56  ;;  %v2993_v56 = vld [vmem:[%s4064_s7 + $0x1] ss:$0 sm:$0xff] }
 0xba2   : > { %v3436_v57 = vpop.eup %3435 }
 0xba3   : > { %v1597_v59 = vmul.f32 %v3436_v57, %v1589_v48 }
 0xba5   : > { %v1604_v61 = vmul.f32 %v2965_v58, %v1597_v59 }
 0xba7   : > { %v1611_v40 = vadd.f32 %v2966_v60, %v1604_v61 }
 0xba9   : > { %v1612_v44 = vpack.c.bf16 %v1611_v40, %v1611_v40 }
 0xbab   : > { %3251 = vmatmul.mubr.msk.bf16.vlgmr.msra.gmra.mxu0 %vm766_vm3, %v1612_v44 }
 0xbac   : > { %3270 = vmatprep.mubr.msk.bf16.mxu0 %vm3468_vm1, %v3467_v2  ;;  %3267 = vmatpush3.bf16.msra.mxu0 %v3407_v23 }
 0xbad   : > { %3268 = vmatprep.subr.bf16.mxu0 %v3467_v2 }
 0xbb0   : > { %3269 = vmatpush3.bf16.msra.mxu0 %v3409_v25 }
 0xbb1   : > { %3274 = vmatprep.subr.bf16.mxu0 %v3467_v2 }
 0xc6b   : > { %v1673_v1 = vpop.f32.mrf.mxu0 }
 0xc6c   : > { %v1674_v3 = vadd.f32 %v2967_v0, %v1673_v1 }
 0xc6d   : > { %v3252_v4 = vpop.f32.mrf.mxu0 }
 0xc6e   : > { %v1679_v5 = vmax.f32 %v1674_v3, 0.0 }
 0xc6f   : > { %v1676_v6 = vpop.f32.mrf.mxu0 }
 0xc70   : > { %v1680_v7 = vpack.c.bf16 %v1679_v5, %v1679_v5 }
 0xc71   : > { %v3253_v8 = vpop.f32.mrf.mxu0 }
 0xc72   : > { %3263 = vmatmul.mubr.msk.bf16.vlgmr.msra.gmra.mxu1 %vm1720_vm6, %v1680_v7 }
 0xc73   : > { %3286 = vmatprep.mubr.msk.bf16.mxu1 %vm3468_vm1, %v3467_v2  ;;  %3283 = vmatpush3.bf16.msra.mxu1 %v3408_v24 }
 0xc74   : > { %3284 = vmatprep.subr.bf16.mxu1 %v3467_v2 }
 0xc77   : > { %3285 = vmatpush3.bf16.msra.mxu1 %v3410_v27 }
 0xc78   : > { %3296 = vmatprep.subr.bf16.mxu1 %v3467_v2 }
 0xd32   : > { %v1758_v10 = vpop.f32.mrf.mxu1 }
 0xd33   : > { %v1759_v11 = vadd.f32 %v2971_v9, %v1758_v10 }
 0xd34   : > { %v3264_v12 = vpop.f32.mrf.mxu1 }
 0xd35   : > { %v1764_v13 = vadd.f32 %v1759_v11, %v1611_v40 }
 0xd36   : > { %v1761_v14 = vpop.f32.mrf.mxu1 }
 0xd37   : > { %v1767_v16 = vsel %vm766_vm3, %v1764_v13, 0.0 }
 0xd38   : > { %1768 = vadd.xlane.f32.xlu0 %v1767_v16  ;;  %v3265_v17 = vpop.f32.mrf.mxu1 }
 0xdc1   : > { %v1769_v18 = vpop.xlane.xlu0 %1768 }
 0xdc2   : > { %v1770_v19 = vmul.f32 0.03125, %v1769_v18 }
 0xdc4   : > { %v1771_v20 = vsub.f32 %v1764_v13, %v1770_v19 }
 0xdc6   : > { %v1772_v21 = vmul.f32 %v1771_v20, %v1771_v20 }
 0xdc8   : > { %v1773_v22 = vsel %vm766_vm3, %v1772_v21, 0.0 }
 0xdc9   : > { %1774 = vadd.xlane.f32.xlu0 %v1773_v22 }
 0xe52   : > { %v1775_v26 = vpop.xlane.xlu0 %1774 }
 0xe53   : > { %v1776_v28 = vmul.f32 0.03125, %v1775_v26  ;;  %v3007_v26 = vld [vmem:[%s4067_s10 + $0x14] sm:$0xf] }
 0xe55   : > { %v1777_v29 = vadd.f32 1e-05, %v1776_v28  ;;  %v2225_v28 = vsel %vm1006_vm4, %v3007_v26, 0 }
 0xe57   : > { %3437 = vrsqrt.f32 %v1777_v29 }
 0xe64   : > { %v3438_v30 = vpop.eup %3437 }
 0xe65   : > { %v1779_v32 = vmul.f32 %v3438_v30, %v1771_v20 }
 0xe67   : > { %v1786_v34 = vmul.f32 %v2977_v31, %v1779_v32 }
 0xe69   : > { %v3852_v35 = vadd.f32 %v2978_v33, %v1786_v34  ;;  %v3006_v33 = vld [vmem:[%s4067_s10 + $0x10] sm:$0xf] }
 0xe6b   : > { %v1794_v37 = vpack.c.bf16 %v3852_v35, %v3852_v35 }
 0xe6d   : > { %3271 = vmatmul.mubr.msk.bf16.vlgmr.msra.gmra.mxu0 %vm766_vm3, %v1794_v37  ;;  %3287 = vmatmul.mubr.msk.bf16.vlgmr.msra.gmra.mxu1 %vm766_vm3, %v1794_v37 }
 0xe6e   : > { %3275 = vmatpush3.bf16.msra.mxu0 %v3411_v36  ;;  %3278 = vmatprep.mubr.msk.bf16.mxu0 %vm3468_vm1, %v3467_v2 }
 0xe6f   : > { %3276 = vmatprep.subr.bf16.mxu0 %v3467_v2  ;;  %3298 = vmatprep.mubr.msk.bf16.mxu1 %vm3468_vm1, %v3467_v2 }
 0xe72   : > { %3277 = vmatpush3.bf16.msra.mxu0 %v3412_v38 }
 0xe73   : > { %3290 = vmatprep.subr.bf16.mxu0 %v3467_v2 }
 0xe75   : > { %3279 = vmatmul.mubr.msk.bf16.vlgmr.msra.gmra.mxu0 %vm766_vm3, %v1794_v37  ;;  %v2271_v37 = vsel %vm1006_vm4, %v3006_v33, 0 }
 0xe76   : > { %3292 = vmatprep.mubr.msk.bf16.mxu0 %vm3468_vm1, %v3467_v2 }
 0xf2d   : > { %v1857_v42 = vpop.f32.mrf.mxu0  ;;  %v1987_v43 = vpop.f32.mrf.mxu1 }
 0xf2e   : > { %v1858_v45 = vadd.f32 %v2984_v39, %v1857_v42  ;;  %v1988_v46 = vadd.f32 %v3002_v41, %v1987_v43 }
 0xf2f   : > { %v3272_v47 = vpop.f32.mrf.mxu0  ;;  %v3288_v48 = vpop.f32.mrf.mxu1 }
 0xf30   : > { %v1993_v49 = vmul.f32 0.35355338, %v1858_v45  ;;  %v3879_v50 = vpack.c.bf16 %v1988_v46, %v1988_v46 }
 0xf31   : > { %v1860_v51 = vpop.f32.mrf.mxu0  ;;  %v1990_v15 = vpop.f32.mrf.mxu1 }
 0xf32   : > { %v3881_v52 = vpack.c.bf16 %v1993_v49, %v1993_v49  ;;  %v2064_v53 = vsel %vm1006_vm4, %v3879_v50, 0 }
 0xf33   : > { %v3273_v54 = vpop.f32.mrf.mxu0  ;;  %v3289_v55 = vpop.f32.mrf.mxu1  ;;  %3297 = vmatpush3.bf16.msra.mxu1 %v2064_v53 }
 0xf34   : > { %2108 = vrot.lane.b32.xlu1 %v3881_v52, %s3469_s27  ;;  %3308 = vmatprep.subr.bf16.mxu1 %v3467_v2 }
 0xf35   : > { %v1922_v57 = vpop.f32.mrf.mxu0 }
 0xf36   : > { %v1923_v58 = vadd.f32 %v2993_v56, %v1922_v57 }
 0xf37   : > { %v3280_v59 = vpop.f32.mrf.mxu0 }
 0xf38   : > { %v3891_v60 = vpack.c.bf16 %v1923_v58, %v1923_v58 }
 0xf39   : > { %v1925_v61 = vpop.f32.mrf.mxu0 }
 0xf3a   : > { %2111 = vrot.lane.b32.xlu0 %v3891_v60, %s3469_s27  ;;  %v2006_v40 = vsel %vm944_vm5, %v3891_v60, 0 }
 0xf3b   : > { %v3281_v44 = vpop.f32.mrf.mxu0  ;;  %3291 = vmatpush3.bf16.xpose.msra.mxu0 %v2006_v40 }
 0xf3c   : > { %3302 = vmatprep.subr.bf16.mxu0 %v3467_v2 }
 0xf42   : > { %3293 = vmatmul.mubr.msk.bf16.vlgmr.msra.gmra.mxu0 %vm944_vm5, %v3881_v52 }
 0xf43   : > { %3304 = vmatprep.mubr.msk.bf16.mxu0 %vm3468_vm1, %v3467_v2 }
 0xfa6   : > { %v2109_v0 = vpop.permute.xlu1 %2108 }
 0xfac   : > { %v2112_v62 = vpop.permute.xlu0 %2111 }
 0xfad   : > { %v2117_v63 = vsel %vm944_vm5, %v2112_v62, 0 }
 0xfae   : > { %3303 = vmatpush3.bf16.xpose.msra.mxu0 %v2117_v63 }
 0xfaf   : > { %3314 = vmatprep.subr.bf16.mxu0 %v3467_v2 }
 0xfb5   : > { %3305 = vmatmul.mubr.msk.bf16.vlgmr.msra.gmra.mxu0 %vm944_vm5, %v2109_v0 }
 0xfb6   : > { %3316 = vmatprep.mubr.msk.bf16.mxu0 %vm3468_vm1, %v3467_v2  ;;  %3315 = vmatpush3.bf16.msra.mxu0 %v2225_v28 }
 0xfb7   : > { %3326 = vmatprep.subr.bf16.mxu0 %v3467_v2 }
0x1002   : > { %v2042_v1 = vpop.f32.mrf.mxu0 }
0x1003   : > { %v2048_v3 = vsel %vm944_vm5, %v2042_v1, -inf }
0x1004   : > { %2049 = vmax.xlane.f32.xlu0 %v2048_v3  ;;  %v3294_v4 = vpop.f32.mrf.mxu0 }
0x1006   : > { %v2045_v5 = vpop.f32.mrf.mxu0 }
0x1008   : > { %v3295_v6 = vpop.f32.mrf.mxu0 }
0x1075   : > { %v2153_v7 = vpop.f32.mrf.mxu0 }
0x1076   : > { %v2159_v8 = vsel %vm944_vm5, %v2153_v7, -inf }
0x1077   : > { %2160 = vmax.xlane.f32.xlu1 %v2159_v8  ;;  %v3306_v9 = vpop.f32.mrf.mxu0 }
0x1079   : > { %v2156_v10 = vpop.f32.mrf.mxu0 }
0x107b   : > { %v3307_v11 = vpop.f32.mrf.mxu0 }
0x1088   : > { %2315 = vrot.lane.b32.xlu1 %v3891_v60, %s3470_s3 }
0x108d   : > { %v2050_v12 = vpop.xlane.xlu0 %2049 }
0x108e   : > { %v2051_v13 = vsub.f32 %v2042_v1, %v2050_v12 }
0x1090   : > { %v2052_v14 = vmul.f32 1.442695, %v2051_v13 }
0x1092   : > { %3439 = vpow2.f32 %v2052_v14 }
0x109f   : > { %v3440_v16 = vpop.eup %3439 }
0x10a0   : > { %v2054_v17 = vsel %vm944_vm5, %v3440_v16, 0.0 }
0x10a1   : > { %2055 = vadd.xlane.f32.xlu0 %v2054_v17 }
0x1100   : > { %v2161_v18 = vpop.xlane.xlu1 %2160 }
0x1101   : > { %v2162_v19 = vsub.f32 %v2153_v7, %v2161_v18 }
0x1103   : > { %v2163_v20 = vmul.f32 1.442695, %v2162_v19 }
0x1104   : > { %v2316_v45 = vpop.permute.xlu1 %2315 }
0x1105   : > { %3441 = vpow2.f32 %v2163_v20  ;;  %v2321_v49 = vsel %vm944_vm5, %v2316_v45, 0 }
0x1112   : > { %v3442_v21 = vpop.eup %3441 }
0x1113   : > { %v2165_v22 = vsel %vm944_vm5, %v3442_v21, 0.0 }
0x1114   : > { %2166 = vadd.xlane.f32.xlu0 %v2165_v22 }
0x112a   : > { %v2056_v23 = vpop.xlane.xlu0 %2055  ;;  %2172 = vrot.lane.b32.xlu0 %v3879_v50, %s3469_s27 }
0x112b   : > { %3443 = vrcp.f32 %v2056_v23 }
0x112e   : > { %2313 = vrot.lane.b32.xlu0 %v3881_v52, %s3470_s3 }
0x1138   : > { %v3444_v24 = vpop.eup %3443 }
0x1139   : > { %v2058_v25 = vmul.f32 %v3444_v24, %v3440_v16  ;;  %v3008_v16 = vld [vmem:[%s4067_s10 + $0x18] sm:$0xf] }
0x113a   : > { %v2428_v17 = vsel %vm1006_vm4, %v3008_v16, 0 }
0x113b   : > { %v2059_v27 = vpack.c.bf16 %v2058_v25, %v2058_v25 }
0x113d   : > { %3299 = vmatmul.mubr.msk.bf16.vlgmr.msra.gmra.mxu1 %vm944_vm5, %v2059_v27 }
0x113e   : > { %3310 = vmatprep.mubr.msk.bf16.mxu1 %vm3468_vm1, %v3467_v2 }
0x119d   : > { %v2167_v29 = vpop.xlane.xlu0 %2166 }
0x119e   : > { %3445 = vrcp.f32 %v2167_v29 }
0x11a1   : > { %v2173_v30 = vpop.permute.xlu0 %2172 }
0x11a2   : > { %v2178_v31 = vsel %vm1006_vm4, %v2173_v30, 0 }
0x11a3   : > { %3309 = vmatpush3.bf16.msra.mxu1 %v2178_v31 }
0x11a4   : > { %3320 = vmatprep.subr.bf16.mxu1 %v3467_v2 }
0x11a5   : > { %v2314_v53 = vpop.permute.xlu0 %2313 }
0x11ab   : > { %v3446_v32 = vpop.eup %3445 }
0x11ac   : > { %v2169_v34 = vmul.f32 %v3446_v32, %v3442_v21 }
0x11ae   : > { %v2170_v36 = vpack.c.bf16 %v2169_v34, %v2169_v34 }
0x11b0   : > { %3311 = vmatmul.mubr.msk.bf16.vlgmr.msra.gmra.mxu1 %vm944_vm5, %v2170_v36 }
0x11b1   : > { %3321 = vmatpush3.bf16.msra.mxu1 %v2271_v37  ;;  %3322 = vmatprep.mubr.msk.bf16.mxu1 %vm3468_vm1, %v3467_v2 }
0x11b2   : > { %3332 = vmatprep.subr.bf16.mxu1 %v3467_v2 }
0x11fd   : > { %v2100_v38 = vpop.f32.mrf.mxu1 }
0x11fe   : > { %v2106_v39 = vpack.c.bf16 %v2100_v38, %v2100_v38 }
0x11ff   : > { %v3300_v41 = vpop.f32.mrf.mxu1 }
0x1200   : > { %3323 = vmatmul.mubr.msk.bf16.vlgmr.msra.gmra.mxu1 %vm944_vm5, %v2106_v39 }
0x1201   : > { %v2103_v42 = vpop.f32.mrf.mxu1  ;;  %3334 = vmatprep.mubr.msk.bf16.mxu1 %vm3468_vm1, %v3467_v2 }
0x1203   : > { %v3301_v43 = vpop.f32.mrf.mxu1 }
0x1270   : > { %v2214_v46 = vpop.f32.mrf.mxu1 }
0x1271   : > { %v2220_v47 = vpack.c.bf16 %v2214_v46, %v2214_v46 }
0x1272   : > { %v3312_v48 = vpop.f32.mrf.mxu1 }
0x1273   : > { %3317 = vmatmul.mubr.msk.bf16.vlgmr.msra.gmra.mxu0 %vm944_vm5, %v2220_v47 }
0x1274   : > { %3327 = vmatpush3.bf16.xpose.msra.mxu0 %v2321_v49  ;;  %v2217_v51 = vpop.f32.mrf.mxu1  ;;  %3328 = vmatprep.mubr.msk.bf16.mxu0 %vm3468_vm1, %v3467_v2 }
0x1275   : > { %3338 = vmatprep.subr.bf16.mxu0 %v3467_v2 }
0x1276   : > { %v3313_v15 = vpop.f32.mrf.mxu1 }
0x127b   : > { %3329 = vmatmul.mubr.msk.bf16.vlgmr.msra.gmra.mxu0 %vm944_vm5, %v2314_v53 }
0x127c   : > { %3340 = vmatprep.mubr.msk.bf16.mxu0 %vm3468_vm1, %v3467_v2  ;;  %3339 = vmatpush3.bf16.msra.mxu0 %v2428_v17  ;;  %v3417_v17 = vld [vmem:[%s4073_s16 + $0x28] sm:$0xff]  }
0x127d   : > { %3350 = vmatprep.subr.bf16.mxu0 %v3467_v2 }
0x12c0   : > { %v3946_v54 = vpop.f32.mrf.mxu1 }
0x12c2   : > { %v3324_v55 = vpop.f32.mrf.mxu1 }
0x12c4   : > { %v2310_v56 = vpop.f32.mrf.mxu1 }
0x12c6   : > { %v3325_v57 = vpop.f32.mrf.mxu1 }
0x1333   : > { %v3948_v58 = vpop.f32.mrf.mxu0 }
0x1334   : > { %v2308_v36 = vadd.f32 %v3946_v54, %v3948_v58  ;;  %v3023_v58 = vld [vmem:[%s4068_s11 + $0x1] ss:$0 sm:$0xff] }
0x1335   : > { %v3318_v59 = vpop.f32.mrf.mxu0 }
0x1337   : > { %v2264_v61 = vpop.f32.mrf.mxu0 }
0x1339   : > { %v3319_v40 = vpop.f32.mrf.mxu0 }
0x133b   : > { %v2357_v44 = vpop.f32.mrf.mxu0 }
0x133c   : > { %v2363_v62 = vsel %vm944_vm5, %v2357_v44, -inf }
0x133d   : > { %2364 = vmax.xlane.f32.xlu1 %v2363_v62  ;;  %v3330_v63 = vpop.f32.mrf.mxu0 }
0x133f   : > { %v2360_v0 = vpop.f32.mrf.mxu0 }
0x1341   : > { %v3331_v1 = vpop.f32.mrf.mxu0 }
0x134e   : > { %2473 = vrot.lane.b32.xlu1 %v3891_v60, %s3471_s5 }
0x1352   : > { %2471 = vrot.lane.b32.xlu1 %v3881_v52, %s3471_s5 }
0x13c6   : > { %v2365_v3 = vpop.xlane.xlu1 %2364 }
0x13c7   : > { %v2366_v4 = vsub.f32 %v2357_v44, %v2365_v3 }
0x13c9   : > { %v2367_v5 = vmul.f32 1.442695, %v2366_v4 }
0x13ca   : > { %v2474_v11 = vpop.permute.xlu1 %2473 }
0x13cb   : > { %3447 = vpow2.f32 %v2367_v5  ;;  %v2479_v13 = vsel %vm944_vm5, %v2474_v11, 0  ;;  %v3413_v5 = vld [vmem:[%s4071_s14 + $0x18] sm:$0xff]  }
0x13ce   : > { %v2472_v14 = vpop.permute.xlu1 %2471 }
0x13d8   : > { %v3448_v6 = vpop.eup %3447 }
0x13d9   : > { %v2369_v7 = vsel %vm944_vm5, %v3448_v6, 0.0 }
0x13da   : > { %2370 = vadd.xlane.f32.xlu0 %v2369_v7  ;;  %v3416_v7 = vld [vmem:[%s4073_s16 + $0x30] sm:$0xff]  }
0x13f0   : > { %2375 = vrot.lane.b32.xlu0 %v3879_v50, %s3470_s3 }
0x1463   : > { %v2371_v8 = vpop.xlane.xlu0 %2370 }
0x1464   : > { %3449 = vrcp.f32 %v2371_v8 }
0x1467   : > { %v2376_v9 = vpop.permute.xlu0 %2375 }
0x1468   : > { %v2381_v10 = vsel %vm1006_vm4, %v2376_v9, 0 }
0x1469   : > { %3333 = vmatpush3.bf16.msra.mxu1 %v2381_v10 }
0x146a   : > { %3344 = vmatprep.subr.bf16.mxu1 %v3467_v2 }
0x1471   : > { %v3450_v52 = vpop.eup %3449 }
0x1472   : > { %v2373_v60 = vmul.f32 %v3450_v52, %v3448_v6  ;;  %v3415_v6 = vld [vmem:[%s4073_s16 + $0x38] sm:$0xff]  }
0x1474   : > { %v2374_v12 = vpack.c.bf16 %v2373_v60, %v2373_v60  ;;  %v3026_v60 = vld [vmem:[%s4069_s12 + $0x1] ss:$0 sm:$0xff] }
0x1476   : > { %3335 = vmatmul.mubr.msk.bf16.vlgmr.msra.gmra.mxu1 %vm944_vm5, %v2374_v12  ;;  %v3027_v12 = vld [vmem:[%s4070_s13 + $0x1] ss:$0 sm:$0xff] }
0x1477   : > { %3345 = vmatpush3.bf16.xpose.msra.mxu1 %v2479_v13  ;;  %3346 = vmatprep.mubr.msk.bf16.mxu1 %vm3468_vm1, %v3467_v2 }
0x1478   : > { %3356 = vmatprep.subr.bf16.mxu1 %v3467_v2 }
0x147e   : > { %3347 = vmatmul.mubr.msk.bf16.vlgmr.msra.gmra.mxu1 %vm944_vm5, %v2472_v14 }
0x147f   : > { %3358 = vmatprep.mubr.msk.bf16.mxu1 %vm3468_vm1, %v3467_v2 }
0x1536   : > { %v2417_v18 = vpop.f32.mrf.mxu1 }
0x1537   : > { %v2423_v19 = vpack.c.bf16 %v2417_v18, %v2417_v18  ;;  %v3418_v18 = vld [vmem:[%s4073_s16 + $0x20] sm:$0xff]  }
0x1538   : > { %v3336_v20 = vpop.f32.mrf.mxu1 }
0x1539   : > { %3341 = vmatmul.mubr.msk.bf16.vlgmr.msra.gmra.mxu0 %vm944_vm5, %v2423_v19  ;;  %v3033_v19 = vld [vmem:[%s4072_s15 + $0x1] ss:$0 sm:$0xff] }
0x153a   : > { %v2420_v21 = vpop.f32.mrf.mxu1  ;;  %3352 = vmatprep.mubr.msk.bf16.mxu0 %vm3468_vm1, %v3467_v2 }
0x153c   : > { %v3337_v22 = vpop.f32.mrf.mxu1 }
0x153e   : > { %v2515_v23 = vpop.f32.mrf.mxu1 }
0x153f   : > { %v2521_v24 = vsel %vm944_vm5, %v2515_v23, -inf }
0x1540   : > { %2522 = vmax.xlane.f32.xlu0 %v2521_v24  ;;  %v3348_v25 = vpop.f32.mrf.mxu1 }
0x1542   : > { %v2518_v27 = vpop.f32.mrf.mxu1 }
0x1544   : > { %v3349_v26 = vpop.f32.mrf.mxu1 }
0x1556   : > { %2533 = vrot.lane.b32.xlu0 %v3879_v50, %s3471_s5  ;;  %v3009_v50 = vld [vmem:[%s4067_s10 + $0x1c] sm:$0xf] }
0x1557   : > { %v2586_v39 = vsel %vm1006_vm4, %v3009_v50, 0 }
0x1558   : > { %3357 = vmatpush3.bf16.msra.mxu1 %v2586_v39 }
0x1559   : > { %3370 = vmatprep.subr.bf16.mxu1 %v3467_v2 }
0x15c9   : > { %v2523_v28 = vpop.xlane.xlu0 %2522 }
0x15ca   : > { %v2524_v29 = vsub.f32 %v2515_v23, %v2523_v28 }
0x15cc   : > { %v2525_v30 = vmul.f32 1.442695, %v2524_v29 }
0x15cd   : > { %v2534_v31 = vpop.permute.xlu0 %2533 }
0x15ce   : > { %3451 = vpow2.f32 %v2525_v30  ;;  %v2539_v32 = vsel %vm1006_vm4, %v2534_v31, 0 }
0x15cf   : > { %3351 = vmatpush3.bf16.msra.mxu0 %v2539_v32 }
0x15d0   : > { %3362 = vmatprep.subr.bf16.mxu0 %v3467_v2 }
0x15db   : > { %v3452_v33 = vpop.eup %3451 }
0x15dc   : > { %v2527_v34 = vsel %vm944_vm5, %v3452_v33, 0.0 }
0x15dd   : > { %2528 = vadd.xlane.f32.xlu1 %v2527_v34 }
0x15f9   : > { %v2464_v37 = vpop.f32.mrf.mxu0 }
0x15fa   : > { %v2470_v38 = vadd.f32 %v2464_v37, %v2308_v36 }
0x15fb   : > { %v3342_v41 = vpop.f32.mrf.mxu0 }
0x15fd   : > { %v2467_v42 = vpop.f32.mrf.mxu0 }
0x15ff   : > { %v3343_v43 = vpop.f32.mrf.mxu0 }
0x1666   : > { %v2529_v45 = vpop.xlane.xlu1 %2528 }
0x1667   : > { %3453 = vrcp.f32 %v2529_v45  ;;  %v3054_v45 = vld [vmem:[%s4075_s18 + $0x1] ss:$0 sm:$0xff] }
0x1674   : > { %v3454_v46 = vpop.eup %3453 }
0x1675   : > { %v2531_v47 = vmul.f32 %v3454_v46, %v3452_v33 }
0x1677   : > { %v2532_v48 = vpack.c.bf16 %v2531_v47, %v2531_v47  ;;  %v3055_v47 = vld [vmem:[%s4076_s19 + $0x1] ss:$0 sm:$0xff] }
0x1679   : > { %3353 = vmatmul.mubr.msk.bf16.vlgmr.msra.gmra.mxu0 %vm944_vm5, %v2532_v48 }
0x167a   : > { %3366 = vmatprep.mubr.msk.bf16.mxu0 %vm3468_vm1, %v3467_v2  ;;  %3363 = vmatpush3.bf16.msra.mxu0 %v3413_v5 }
0x167b   : > { %3364 = vmatprep.subr.bf16.mxu0 %v3467_v2 }
0x1739   : > { %v2575_v49 = vpop.f32.mrf.mxu0 }
0x173a   : > { %v2581_v51 = vpack.c.bf16 %v2575_v49, %v2575_v49  ;;  %v3056_v49 = vld [vmem:[%s4077_s20] ss:$0 sm:$0xff] }
0x173b   : > { %v3354_v15 = vpop.f32.mrf.mxu0 }
0x173c   : > { %3359 = vmatmul.mubr.msk.bf16.vlgmr.msra.gmra.mxu1 %vm944_vm5, %v2581_v51 }
0x173d   : > { %v2578_v53 = vpop.f32.mrf.mxu0  ;;  %3378 = vmatprep.mubr.msk.bf16.mxu1 %vm3468_vm1, %v3467_v2  ;;  %3371 = vmatpush3.bf16.msra.mxu1 %v3415_v6 }
0x173e   : > { %3372 = vmatprep.subr.bf16.mxu1 %v3467_v2 }
0x173f   : > { %v3355_v54 = vpop.f32.mrf.mxu0 }
0x1740   : > { %v3057_v54 = vld [vmem:[#allocation2] ss:$0 sm:$0xff] }
0x1741   : > { %3373 = vmatpush3.bf16.msra.mxu1 %v3416_v7 }
0x1742   : > { %3374 = vmatprep.subr.bf16.mxu1 %v3467_v2 }
0x1745   : > { %3375 = vmatpush3.bf16.msra.mxu1 %v3417_v17 }
0x1746   : > { %3376 = vmatprep.subr.bf16.mxu1 %v3467_v2  ;;  %v3046_v2 = vld [vmem:[%s4074_s17 + $0x1] ss:$0 sm:$0xff] }
0x1749   : > { %3377 = vmatpush3.bf16.msra.mxu1 %v3418_v18 }
0x17fc   : > { %v2622_v55 = vpop.f32.mrf.mxu1 }
0x17fd   : > { %v2628_v56 = vadd.f32 %v2622_v55, %v2470_v38 }
0x17fe   : > { %v3360_v57 = vpop.f32.mrf.mxu1 }
0x17ff   : > { %v2629_v59 = vadd.f32 %v2628_v56, %v3852_v35  ;;  %v3414_v35 = vld [vmem:[%s4071_s14 + $0x10] sm:$0xff]  }
0x1800   : > { %v2625_v61 = vpop.f32.mrf.mxu1  ;;  %3365 = vmatpush3.bf16.msra.mxu0 %v3414_v35 }
0x1801   : > { %v2638_v40 = vadd.f32 %v3023_v58, %v2629_v59 }
0x1802   : > { %v3361_v44 = vpop.f32.mrf.mxu1 }
0x1803   : > { %v2643_v62 = vsel %vm766_vm3, %v2638_v40, 0.0 }
0x1804   : > { %2644 = vadd.xlane.f32.xlu1 %v2643_v62 }
0x188d   : > { %v2645_v63 = vpop.xlane.xlu1 %2644 }
0x188e   : > { %v2646_v0 = vmul.f32 0.03125, %v2645_v63 }
0x1890   : > { %v2647_v1 = vsub.f32 %v2638_v40, %v2646_v0 }
0x1892   : > { %v2648_v3 = vmul.f32 %v2647_v1, %v2647_v1 }
0x1894   : > { %v2649_v4 = vsel %vm766_vm3, %v2648_v3, 0.0 }
0x1895   : > { %2650 = vadd.xlane.f32.xlu1 %v2649_v4 }
0x191e   : > { %v2651_v8 = vpop.xlane.xlu1 %2650 }
0x191f   : > { %v2652_v9 = vmul.f32 0.03125, %v2651_v8 }
0x1921   : > { %v2653_v10 = vadd.f32 1e-05, %v2652_v9 }
0x1923   : > { %3455 = vrsqrt.f32 %v2653_v10 }
0x1930   : > { %v3456_v52 = vpop.eup %3455 }
0x1931   : > { %v2655_v11 = vmul.f32 %v3456_v52, %v2647_v1 }
0x1933   : > { %v2662_v13 = vmul.f32 %v3026_v60, %v2655_v11 }
0x1935   : > { %v2669_v14 = vadd.f32 %v3027_v12, %v2662_v13 }
0x1937   : > { %v2670_v16 = vpack.c.bf16 %v2669_v14, %v2669_v14 }
0x1939   : > { %3367 = vmatmul.mubr.msk.bf16.vlgmr.msra.gmra.mxu0 %vm766_vm3, %v2670_v16 }
0x19f9   : > { %v2733_v20 = vpop.f32.mrf.mxu0 }
0x19fa   : > { %v2734_v21 = vadd.f32 %v3033_v19, %v2733_v20 }
0x19fb   : > { %v3368_v22 = vpop.f32.mrf.mxu0 }
0x19fc   : > { %v2739_v23 = vmax.f32 %v2734_v21, 0.0 }
0x19fd   : > { %v2736_v24 = vpop.f32.mrf.mxu0 }
0x19fe   : > { %v2740_v25 = vpack.c.bf16 %v2739_v23, %v2739_v23 }
0x19ff   : > { %v3369_v27 = vpop.f32.mrf.mxu0 }
0x1a00   : > { %3379 = vmatmul.mubr.msk.bf16.vlgmr.msra.gmra.mxu1 %vm1720_vm6, %v2740_v25 }
0x1ac0   : > { %v2819_v26 = vpop.f32.mrf.mxu1 }
0x1ac1   : > { %v2820_v28 = vadd.f32 %v3046_v2, %v2819_v26 }
0x1ac2   : > { %v3380_v29 = vpop.f32.mrf.mxu1 }
0x1ac3   : > { %v2825_v30 = vadd.f32 %v2820_v28, %v2669_v14 }
0x1ac4   : > { %v2822_v31 = vpop.f32.mrf.mxu1 }
0x1ac5   : > { %v2830_v32 = vsel %vm766_vm3, %v2825_v30, 0.0 }
0x1ac6   : > { %2831 = vadd.xlane.f32.xlu1 %v2830_v32  ;;  %v3381_v33 = vpop.f32.mrf.mxu1 }
0x1b4f   : > { %v2832_v34 = vpop.xlane.xlu1 %2831 }
0x1b50   : > { %v2833_v36 = vmul.f32 0.03125, %v2832_v34 }
0x1b52   : > { %v2834_v37 = vsub.f32 %v2825_v30, %v2833_v36 }
0x1b54   : > { %v2835_v50 = vmul.f32 %v2834_v37, %v2834_v37 }
0x1b56   : > { %v2836_v38 = vsel %vm766_vm3, %v2835_v50, 0.0 }
0x1b57   : > { %2837 = vadd.xlane.f32.xlu1 %v2836_v38 }
0x1be0   : > { %v2838_v39 = vpop.xlane.xlu1 %2837 }
0x1be1   : > { %v2839_v41 = vmul.f32 0.03125, %v2838_v39 }
0x1be3   : > { %v2840_v42 = vadd.f32 1e-05, %v2839_v41 }
0x1be5   : > { %3457 = vrsqrt.f32 %v2840_v42 }
0x1bf2   : > { %v3458_v43 = vpop.eup %3457 }
0x1bf3   : > { %v2842_v46 = vmul.f32 %v3458_v43, %v2834_v37 }
0x1bf5   : > { %v2849_v48 = vmul.f32 %v3054_v45, %v2842_v46 }
0x1bf7   : > { %v2856_v51 = vadd.f32 %v3055_v47, %v2849_v48 }
0x1bf9   : > { %v2864_v15 = vmul.f32 %v3056_v49, %v2856_v51 }
0x1bfb   : > { %v2865_v53 = vsel %vm766_vm3, %v2864_v15, 0.0 }
0x1bfc   : > { %2866 = vadd.xlane.f32.xlu0 %v2865_v53 }
0x1c85   : > { %v2867_v55 = vpop.xlane.xlu0 %2866 }
0x1c86   : > { %v2875_v56 = vadd.f32 %v3057_v54, %v2867_v55 }
0x1c88   : > { %2877 = vst.msk [vmem:[%s680_s0] sm:$0xff] %vm2876_vm7, %v2875_v56 }
0x1c89 PF: > { %s34_s29 = sadd.s32 1, %s3465_s29  }
0x1c8a   : > { %p31_p4 = scmp.ge.s32.totalorder %s34_s29, 4  }
0x1c8c   :  { %33 = sbr.rel (!%p31_p4) target bundleno = 8 (0x8), region = 154 }

</bundles_post_ra>
